<compile_context>
chip_gen: v7x
topology: tpu7x:2x2x1
jax: 0.10.0
libtpu: 0.0.40
codegen_flags: <defaults>
</compile_context>

<pallas_src>
import functools

import numpy as np
import jax
import jax.numpy as jnp
from jax import lax
from jax.experimental import pallas as pl
from jax.experimental.pallas import tpu as pltpu

LANE = 128
CHUNK = 16                              # rows per inner-loop step (2 f32 vregs / slab,
                                        # one native bf16 tile for the mask stream)
VMEM_LIMIT_BYTES = 48 * 1024 * 1024     # raised scoped VMEM; safe on v5e/v6e (128 MiB)
                                        # and leaves headroom on v7x (64 MiB physical)
TILE_VMEM_BUDGET = 24 * 1024 * 1024     # budget for double-buffered slab streams/tile


# --------------------------------------------------------------------------------------
# Synthetic sub-modules.
# TODO(synk): model_AE and model_GradUpdate0 (compute_Grad + gradNet) are external
# nn.Modules in dinae_4dvarnn; they are realized here as deterministic synthetic
# equivalents: a 2-layer 1x1-conv AE with tanh, and the GradType-0 variational gradient
#   grad = alphaAE * (x - xpred) + alphaObs * mask * (x - xobs)
# followed by a bias-free 1x1-conv gradNet, matching the reference code structure.
# --------------------------------------------------------------------------------------


def _proj_ae_kernel(xt_ref, xnt_ref, tm_ref,
                    w1t_ref, w1n_ref, b1_ref, w2_ref, b2_ref,
                    tx_ref, k_ref, ssq_ref, ssq_acc_ref,
                    *, n_proj, ct, cn, hd, alpha_obs, alpha_ae,
                    chunks_per_tile, n_valid_rows, has_pad):
    """Fused NProjFP fixed-point loop + final AE + xpred AE + grad sum-of-squares.

    Large BlockSpec tile for DMA efficiency; compute iterates CHUNK-row sub-chunks so
    the working set stays in vregs (no per-MAC VMEM spill traffic).
    """
    # Hoisted SMEM scalar reads (traced once; scalar*vector lowers to scalar-operand
    # VPU multiplies, no per-MAC vector splat is emitted).
    w1t = [[w1t_ref[i, j] for j in range(ct)] for i in range(hd)]
    w1n = [[w1n_ref[i, j] for j in range(cn)] for i in range(hd)]
    b1 = [b1_ref[i] for i in range(hd)]
    w2 = [[w2_ref[i, j] for j in range(hd)] for i in range(ct)]
    b2 = [b2_ref[i] for i in range(ct)]

    row_iota = lax.broadcasted_iota(jnp.int32, (CHUNK, LANE), 0)
    tile_row0 = pl.program_id(0) * (chunks_per_tile * CHUNK)

    ssq_acc_ref[...] = jnp.zeros_like(ssq_acc_ref)

    @pl.loop(0, chunks_per_tile)
    def _(ci):
        xnt = [xnt_ref[c, ci] for c in range(cn)]
        tm = [tm_ref[c, ci].astype(jnp.float32) for c in range(ct)]
        tobs = [xt_ref[c, ci] for c in range(ct)]        # target_obs == x[:, idx]
        tx = list(tobs)                                  # initial target_x

        # Non-target contribution to the first AE layer: once per chunk (replaces
        # rebuilding the full x via index_fill / index_add every iteration).
        h_const = []
        for j in range(hd):
            a = w1n[j][0] * xnt[0]
            for c in range(1, cn):
                a = a + w1n[j][c] * xnt[c]
            h_const.append(a + b1[j])

        def apply_ae(tx_list):
            # Tiny 1x1-conv channel mixes as unrolled VPU MACs (a padded MXU matmul
            # would be <1% utilized for ct/hd <= 8).
            # TODO(synk): switch to (pixels, C) x (C, Hd) MXU matmuls (and optionally
            # bf16 hidden activations on v6e/v7x) once hd grows past ~32.
            h = []
            for j in range(hd):
                a = h_const[j]
                for c in range(ct):
                    a = a + w1t[j][c] * tx_list[c]
                h.append(jnp.tanh(a))
            out = []
            for c in range(ct):
                a = w2[c][0] * h[0]
                for j in range(1, hd):
                    a = a + w2[c][j] * h[j]
                out.append(a + b2[c])
            return out

        def fp_step(tx_list):
            xp = apply_ae(tx_list)
            return [tx_list[c] * tm[c] + xp[c] * (1.0 - tm[c]) for c in range(ct)]

        if n_proj > 4:
            txs = lax.fori_loop(
                0, n_proj,
                lambda _, t: jnp.stack(fp_step([t[c] for c in range(ct)])),
                jnp.stack(tx))
            tx = [txs[c] for c in range(ct)]
        else:
            for _ in range(n_proj):
                tx = fp_step(tx)

        # InterpFlag == False: one more unmasked AE application (target_x = AE(x)).
        tx = apply_ae(tx)
        # xpred for the gradient phase -- computed ONCE (the reference also computes
        # xpred = model_AE(x) once, before the NGrad loop, and keeps it fixed).
        xpred = apply_ae(tx)

        gsq = None
        for c in range(ct):
            # grad = alphaAE*(tx - xpred) + alphaObs*m*(tx - obs) = s*tx - k
            k_c = alpha_ae * xpred[c] + alpha_obs * tm[c] * tobs[c]
            g = (alpha_ae + alpha_obs * tm[c]) * tx[c] - k_c
            tx_ref[c, ci] = tx[c]
            k_ref[c, ci] = k_c
            gsq = g * g if gsq is None else gsq + g * g
        if has_pad:   # rows added only for tiling must not contribute to normgrad
            row = tile_row0 + ci * CHUNK + row_iota
            gsq = jnp.where(row < n_valid_rows, gsq, 0.0)
        ssq_acc_ref[...] += gsq

    # Per-lane partial sums (no cross-lane reduce / splat); scalar reduce done in JAX.
    acc = ssq_acc_ref[...]
    ssq_ref[0] = acc[:8, :] + acc[8:, :]


def _grad_descent_kernel(tx_ref, k_ref, tm_ref, wg_ref, out_ref,
                         *, n_grad, ct, alpha_obs, alpha_ae, chunks_per_tile):
    """All NGrad gradient-descent steps.

    wg already has alphaGrad / normgrad folded in, and kernel 1 precomputed
    k = alphaAE*xpred + alphaObs*mask*obs, so only three slab streams are read:
    grad_raw = s*tx - k with s = alphaAE + alphaObs*mask (recomputed in-kernel).
    """
    wg = [[wg_ref[i, j] for j in range(ct)] for i in range(ct)]

    @pl.loop(0, chunks_per_tile)
    def _(ci):
        tm = [tm_ref[c, ci].astype(jnp.float32) for c in range(ct)]
        s = [alpha_ae + alpha_obs * tm[c] for c in range(ct)]
        k = [k_ref[c, ci] for c in range(ct)]
        tx = [tx_ref[c, ci] for c in range(ct)]

        def gd_step(tx_list):
            graw = [s[c] * tx_list[c] - k[c] for c in range(ct)]
            upd = []
            for i in range(ct):
                a = wg[i][0] * graw[0]
                for j in range(1, ct):
                    a = a + wg[i][j] * graw[j]
                upd.append(a)
            return [tx_list[c] - upd[c] for c in range(ct)]

        if n_grad > 4:
            txs = lax.fori_loop(
                0, n_grad,
                lambda _, t: jnp.stack(gd_step([t[c] for c in range(ct)])),
                jnp.stack(tx))
            tx = [txs[c] for c in range(ct)]
        else:
            for _ in range(n_grad):
                tx = gd_step(tx)

        for c in range(ct):
            out_ref[c, ci] = tx[c]


# --------------------------------------------------------------------------------------
# Tile planning + wrapper.
# --------------------------------------------------------------------------------------


def _plan_grid(total_chunks, max_chunks_per_tile):
    """n_tiles * chunks_per_tile >= total_chunks, tile <= cap, >= 2 tiles whenever the
    problem has >= 2 chunks (keeps both v7x TensorCores busy). Rows get padded up to
    the plan so the grid always divides exactly (no single-giant-tile fallback)."""
    cap = max(1, max_chunks_per_tile)
    min_tiles = 2 if total_chunks >= 2 else 1
    n_tiles = max(min_tiles, -(-total_chunks // cap))
    cpt = -(-total_chunks // n_tiles)
    return n_tiles, cpt


def _plan_grid_fixed_total(total_chunks, max_chunks_per_tile):
    """Largest divisor tile <= cap with >= 2 tiles when possible (total already fixed
    by kernel 1's padding; the mem-bound kernel 2 wants the biggest tile it can get)."""
    best = 1
    for cpt in range(1, min(max_chunks_per_tile, total_chunks) + 1):
        if total_chunks % cpt != 0:
            continue
        if total_chunks >= 2 and total_chunks // cpt < 2:
            continue
        best = cpt
    return total_chunks // best, best


def model_4dvarnn_gradfp_forward(params, x_inp, mask, *, shape_data, n_proj, n_grad,
                                 ncov, interp_flag=False, normgrad=0.0):
    # TODO(synk): OptimType 1/2 (LSTM model_GradUpdate1/2) and the InterpFlag=True
    # branch of the gradient loop are not implemented; this is the OptimType==0 path.
    assert not interp_flag
    B, C, H, W = x_inp.shape
    assert (C, H, W) == tuple(shape_data)

    idx = np.arange(0, C, ncov + 1)                 # target channel indices (static)
    non_idx = np.setdiff1d(np.arange(C), idx)
    ct, cn = int(idx.shape[0]), int(non_idx.shape[0])
    cn_eff = max(cn, 1)   # ncov == 0: one zero slab + zero weights stand in (TODO(synk): drop stream)

    n_elems = B * H * W
    assert n_elems % LANE == 0, "B*H*W must be a multiple of 128"
    n_rows = n_elems // LANE
    total_chunks = -(-n_rows // CHUNK)

    # ---- VMEM-budget-driven tile plans (chunked compute needs no big scratch) ----
    # kernel 1 streams per row (double-buffered): f32 xt(ct)+xnt(cn)+tx(ct)+k(ct), bf16 tm(ct)
    bytes_per_row1 = 2 * ((3 * ct + cn_eff) * 4 * LANE + ct * 2 * LANE)
    cap1 = max(1, min(256, TILE_VMEM_BUDGET // (bytes_per_row1 * CHUNK)))
    n_tiles1, cpt1 = _plan_grid(total_chunks, cap1)
    padded_chunks = n_tiles1 * cpt1
    padded_rows = padded_chunks * CHUNK

    # kernel 2 streams only 4 ct-slabs -> independent (bigger) tile on the same layout.
    bytes_per_row2 = 2 * (3 * ct * 4 * LANE + ct * 2 * LANE)
    cap2 = max(1, min(512, TILE_VMEM_BUDGET // (bytes_per_row2 * CHUNK)))
    n_tiles2, cpt2 = _plan_grid_fixed_total(padded_chunks, cap2)

    def to_slab(a, dtype=jnp.float32):
        # (B, c, H, W) -> (c, chunks, CHUNK, 128) lane/sublane-dense layout. Padded
        # rows are harmless for the pointwise math and sliced off in from_slab.
        c = a.shape[1]
        s = jnp.transpose(a, (1, 0, 2, 3)).reshape(c, n_rows, LANE)
        if padded_rows != n_rows:
            s = jnp.pad(s, ((0, 0), (0, padded_rows - n_rows), (0, 0)))
        return s.reshape(c, padded_chunks, CHUNK, LANE).astype(dtype)

    def from_slab(s):
        c = s.shape[0]
        s = s.reshape(c, padded_rows, LANE)[:, :n_rows]
        return jnp.transpose(s.reshape(c, B, H, W), (1, 0, 2, 3))

    x = x_inp.astype(jnp.float32)
    m = mask.astype(jnp.float32)

    xt = to_slab(x[:, idx])                           # target obs / initial target_x
    tm = to_slab(m[:, idx], jnp.bfloat16)             # 0/1 mask: exact in bf16, half the bytes
    if cn > 0:
        xnt = to_slab(x[:, non_idx])                  # non-target channels (constant)
        w1n = params["w1"][:, non_idx]
    else:
        xnt = jnp.zeros((1, padded_chunks, CHUNK, LANE), jnp.float32)
        w1n = jnp.zeros((params["w1"].shape[0], 1), jnp.float32)

    w1t = params["w1"][:, idx]
    b1 = params["b1"].reshape(-1)
    w2 = params["w2"]
    b2 = params["b2"].reshape(-1)
    hd = int(w1t.shape[0])

    alpha_obs = float(params["alphaObs"])
    alpha_ae = float(params["alphaAE"])

    smem_spec = pl.BlockSpec(memory_space=pltpu.MemorySpace.SMEM)
    cparams = pltpu.CompilerParams(dimension_semantics=("parallel",),
                                   vmem_limit_bytes=VMEM_LIMIT_BYTES)

    def slab_spec(c, cpt):
        return pl.BlockSpec((c, cpt, CHUNK, LANE), lambda i: (0, i, 0, 0))

    kernel1 = functools.partial(
        _proj_ae_kernel, n_proj=n_proj, ct=ct, cn=cn_eff, hd=hd,
        alpha_obs=alpha_obs, alpha_ae=alpha_ae, chunks_per_tile=cpt1,
        n_valid_rows=n_rows, has_pad=(padded_rows != n_rows))
    tx_f, k_f, ssq_parts = pl.pallas_call(
        kernel1,
        out_shape=(
            jax.ShapeDtypeStruct((ct, padded_chunks, CHUNK, LANE), jnp.float32),
            jax.ShapeDtypeStruct((ct, padded_chunks, CHUNK, LANE), jnp.float32),
            jax.ShapeDtypeStruct((n_tiles1, 8, LANE), jnp.float32),
        ),
        grid=(n_tiles1,),
        in_specs=[
            slab_spec(ct, cpt1),        # xt (target_obs == initial target_x)
            slab_spec(cn_eff, cpt1),    # non-target channels
            slab_spec(ct, cpt1),        # target mask (bf16)
            smem_spec, smem_spec, smem_spec, smem_spec, smem_spec,   # AE weights
        ],
        out_specs=(
            slab_spec(ct, cpt1),                           # target_x
            slab_spec(ct, cpt1),                           # k handoff for the grad phase
            pl.BlockSpec((1, 8, LANE), lambda i: (i, 0, 0)),  # per-tile per-lane grad^2 sums
        ),
        scratch_shapes=[pltpu.VMEM((CHUNK, LANE), jnp.float32)],
        compiler_params=cparams,
    )(xt, xnt, tm, w1t, w1n, b1, w2, b2)

    if n_grad <= 0:
        return from_slab(tx_f), jnp.float32(1.0)

    if normgrad == 0.0:
        sumsq = jnp.sum(ssq_parts)
        # mean over the ct*B*H*W grad elements (matches torch.mean(grad**2)); the tiny
        # epsilon only guards the fully-observed / converged case (sumsq == 0 -> inf).
        _normgrad = jnp.sqrt(sumsq / (ct * n_elems) + 1e-20)
    else:
        _normgrad = jnp.asarray(normgrad, jnp.float32)

    # Fold alphaGrad and 1/normgrad into the (ct, ct) gradNet weights (linear update):
    #   tx -= alphaGrad * wg @ (grad_raw / normgrad)  ==  tx -= wg_eff @ grad_raw
    # TODO(synk): breaks if the real model_GradUpdate0 gradNet has a bias/nonlinearity.
    wg_eff = (jnp.float32(params["alphaGrad"]) / _normgrad) * params["wg"]

    kernel2 = functools.partial(
        _grad_descent_kernel, n_grad=n_grad, ct=ct,
        alpha_obs=alpha_obs, alpha_ae=alpha_ae, chunks_per_tile=cpt2)
    tx_f = pl.pallas_call(
        kernel2,
        out_shape=jax.ShapeDtypeStruct((ct, padded_chunks, CHUNK, LANE), jnp.float32),
        grid=(n_tiles2,),
        in_specs=[
            slab_spec(ct, cpt2),    # target_x (updated in place via aliasing)
            slab_spec(ct, cpt2),    # k = alphaAE*xpred + alphaObs*mask*obs
            slab_spec(ct, cpt2),    # target mask (bf16)
            smem_spec,              # wg_eff
        ],
        out_specs=slab_spec(ct, cpt2),
        input_output_aliases={0: 0},
        compiler_params=cparams,
    )(tx_f, k_f, tm, wg_eff)

    return from_slab(tx_f), _normgrad


def init_params(key, C, Ct, Hd):
    k1, k2, k3, k4, k5 = jax.random.split(key, 5)
    return {
        "w1": 0.1 * jax.random.normal(k1, (Hd, C), jnp.float32),
        "b1": 0.1 * jax.random.normal(k2, (Hd,), jnp.float32),
        "w2": 0.1 * jax.random.normal(k3, (Ct, Hd), jnp.float32),
        "b2": 0.1 * jax.random.normal(k4, (Ct,), jnp.float32),
        "wg": 0.1 * jax.random.normal(k5, (Ct, Ct), jnp.float32),  # 1x1-conv gradNet
        "alphaGrad": 1.0,   # torch.nn.Parameter(torch.Tensor([1.0]))
        "alphaObs": 1.0,    # Compute_Grad alphaObs init
        "alphaAE": 1.0,     # Compute_Grad alphaAE init
    }


if __name__ == "__main__":
    B, C, H, W = 2, 4, 16, 16
    Ncov = 1
    Ct = C // (Ncov + 1)
    Hd = 8
    NProjFP, NGrad = 2, 3

    key = jax.random.PRNGKey(0)
    kx, km = jax.random.split(key)
    x_inp = jax.random.normal(kx, (B, C, H, W), dtype=jnp.float32)
    mask = (jax.random.uniform(km, (B, C, H, W)) > 0.3).astype(jnp.float32)

    params = init_params(jax.random.PRNGKey(42), C, Ct, Hd)

    target_x, normgrad_out = model_4dvarnn_gradfp_forward(
        params, x_inp, mask,
        shape_data=(C, H, W), n_proj=NProjFP, n_grad=NGrad, ncov=Ncov,
        interp_flag=False, normgrad=0.0)

    jax.block_until_ready((target_x, normgrad_out))
    assert target_x.shape == (B, Ct, H, W)
    assert target_x.dtype == jnp.float32
    assert normgrad_out.shape == ()
    print("KERNEL_OK")
</pallas_src>

<mosaic_0001>
module attributes {stable_mosaic.version = 11 : i64} {
  func.func @_proj_ae_kernel(%arg0: i32, %arg1: memref<2x1x16x128xf32, #tpu.memory_space<vmem>>, %arg2: memref<2x1x16x128xf32, #tpu.memory_space<vmem>>, %arg3: memref<2x1x16x128xbf16, #tpu.memory_space<vmem>>, %arg4: memref<8x2xf32, #tpu.memory_space<smem>>, %arg5: memref<8x2xf32, #tpu.memory_space<smem>>, %arg6: memref<8xf32, #tpu.memory_space<smem>>, %arg7: memref<2x8xf32, #tpu.memory_space<smem>>, %arg8: memref<2xf32, #tpu.memory_space<smem>>, %arg9: memref<2x1x16x128xf32, #tpu.memory_space<vmem>>, %arg10: memref<2x1x16x128xf32, #tpu.memory_space<vmem>>, %arg11: memref<1x8x128xf32, #tpu.memory_space<vmem>>, %arg12: memref<16x128xf32, #tpu.memory_space<vmem>>) attributes {dimension_semantics = [#tpu.dimension_semantics<parallel>], iteration_bounds = array<i64: 1>, scalar_prefetch = 0 : i64, scratch_operands = 1 : i64, tpu.core_type = #tpu.core_type<tc>, window_params = [{transform_indices = @transform_0, window_bounds = array<i64: 2, 1, 16, 128>}, {transform_indices = @transform_1, window_bounds = array<i64: 2, 1, 16, 128>}, {transform_indices = @transform_2, window_bounds = array<i64: 2, 1, 16, 128>}, {transform_indices = @transform_3, window_bounds = array<i64: 8, 2>}, {transform_indices = @transform_4, window_bounds = array<i64: 8, 2>}, {transform_indices = @transform_5, window_bounds = array<i64: 8>}, {transform_indices = @transform_6, window_bounds = array<i64: 2, 8>}, {transform_indices = @transform_7, window_bounds = array<i64: 2>}, {transform_indices = @transform_8, window_bounds = array<i64: 2, 1, 16, 128>}, {transform_indices = @transform_9, window_bounds = array<i64: 2, 1, 16, 128>}, {transform_indices = @transform_10, window_bounds = array<i64: 1, 8, 128>}]} {
    %c0 = arith.constant 0 : index
    %c0_0 = arith.constant 0 : index
    %0 = memref.load %arg4[%c0, %c0_0] : memref<8x2xf32, #tpu.memory_space<smem>>
    %c0_1 = arith.constant 0 : index
    %c1 = arith.constant 1 : index
    %1 = memref.load %arg4[%c0_1, %c1] : memref<8x2xf32, #tpu.memory_space<smem>>
    %c1_2 = arith.constant 1 : index
    %c0_3 = arith.constant 0 : index
    %2 = memref.load %arg4[%c1_2, %c0_3] : memref<8x2xf32, #tpu.memory_space<smem>>
    %c1_4 = arith.constant 1 : index
    %c1_5 = arith.constant 1 : index
    %3 = memref.load %arg4[%c1_4, %c1_5] : memref<8x2xf32, #tpu.memory_space<smem>>
    %c2 = arith.constant 2 : index
    %c0_6 = arith.constant 0 : index
    %4 = memref.load %arg4[%c2, %c0_6] : memref<8x2xf32, #tpu.memory_space<smem>>
    %c2_7 = arith.constant 2 : index
    %c1_8 = arith.constant 1 : index
    %5 = memref.load %arg4[%c2_7, %c1_8] : memref<8x2xf32, #tpu.memory_space<smem>>
    %c3 = arith.constant 3 : index
    %c0_9 = arith.constant 0 : index
    %6 = memref.load %arg4[%c3, %c0_9] : memref<8x2xf32, #tpu.memory_space<smem>>
    %c3_10 = arith.constant 3 : index
    %c1_11 = arith.constant 1 : index
    %7 = memref.load %arg4[%c3_10, %c1_11] : memref<8x2xf32, #tpu.memory_space<smem>>
    %c4 = arith.constant 4 : index
    %c0_12 = arith.constant 0 : index
    %8 = memref.load %arg4[%c4, %c0_12] : memref<8x2xf32, #tpu.memory_space<smem>>
    %c4_13 = arith.constant 4 : index
    %c1_14 = arith.constant 1 : index
    %9 = memref.load %arg4[%c4_13, %c1_14] : memref<8x2xf32, #tpu.memory_space<smem>>
    %c5 = arith.constant 5 : index
    %c0_15 = arith.constant 0 : index
    %10 = memref.load %arg4[%c5, %c0_15] : memref<8x2xf32, #tpu.memory_space<smem>>
    %c5_16 = arith.constant 5 : index
    %c1_17 = arith.constant 1 : index
    %11 = memref.load %arg4[%c5_16, %c1_17] : memref<8x2xf32, #tpu.memory_space<smem>>
    %c6 = arith.constant 6 : index
    %c0_18 = arith.constant 0 : index
    %12 = memref.load %arg4[%c6, %c0_18] : memref<8x2xf32, #tpu.memory_space<smem>>
    %c6_19 = arith.constant 6 : index
    %c1_20 = arith.constant 1 : index
    %13 = memref.load %arg4[%c6_19, %c1_20] : memref<8x2xf32, #tpu.memory_space<smem>>
    %c7 = arith.constant 7 : index
    %c0_21 = arith.constant 0 : index
    %14 = memref.load %arg4[%c7, %c0_21] : memref<8x2xf32, #tpu.memory_space<smem>>
    %c7_22 = arith.constant 7 : index
    %c1_23 = arith.constant 1 : index
    %15 = memref.load %arg4[%c7_22, %c1_23] : memref<8x2xf32, #tpu.memory_space<smem>>
    %c0_24 = arith.constant 0 : index
    %c0_25 = arith.constant 0 : index
    %16 = memref.load %arg5[%c0_24, %c0_25] : memref<8x2xf32, #tpu.memory_space<smem>>
    %c0_26 = arith.constant 0 : index
    %c1_27 = arith.constant 1 : index
    %17 = memref.load %arg5[%c0_26, %c1_27] : memref<8x2xf32, #tpu.memory_space<smem>>
    %c1_28 = arith.constant 1 : index
    %c0_29 = arith.constant 0 : index
    %18 = memref.load %arg5[%c1_28, %c0_29] : memref<8x2xf32, #tpu.memory_space<smem>>
    %c1_30 = arith.constant 1 : index
    %c1_31 = arith.constant 1 : index
    %19 = memref.load %arg5[%c1_30, %c1_31] : memref<8x2xf32, #tpu.memory_space<smem>>
    %c2_32 = arith.constant 2 : index
    %c0_33 = arith.constant 0 : index
    %20 = memref.load %arg5[%c2_32, %c0_33] : memref<8x2xf32, #tpu.memory_space<smem>>
    %c2_34 = arith.constant 2 : index
    %c1_35 = arith.constant 1 : index
    %21 = memref.load %arg5[%c2_34, %c1_35] : memref<8x2xf32, #tpu.memory_space<smem>>
    %c3_36 = arith.constant 3 : index
    %c0_37 = arith.constant 0 : index
    %22 = memref.load %arg5[%c3_36, %c0_37] : memref<8x2xf32, #tpu.memory_space<smem>>
    %c3_38 = arith.constant 3 : index
    %c1_39 = arith.constant 1 : index
    %23 = memref.load %arg5[%c3_38, %c1_39] : memref<8x2xf32, #tpu.memory_space<smem>>
    %c4_40 = arith.constant 4 : index
    %c0_41 = arith.constant 0 : index
    %24 = memref.load %arg5[%c4_40, %c0_41] : memref<8x2xf32, #tpu.memory_space<smem>>
    %c4_42 = arith.constant 4 : index
    %c1_43 = arith.constant 1 : index
    %25 = memref.load %arg5[%c4_42, %c1_43] : memref<8x2xf32, #tpu.memory_space<smem>>
    %c5_44 = arith.constant 5 : index
    %c0_45 = arith.constant 0 : index
    %26 = memref.load %arg5[%c5_44, %c0_45] : memref<8x2xf32, #tpu.memory_space<smem>>
    %c5_46 = arith.constant 5 : index
    %c1_47 = arith.constant 1 : index
    %27 = memref.load %arg5[%c5_46, %c1_47] : memref<8x2xf32, #tpu.memory_space<smem>>
    %c6_48 = arith.constant 6 : index
    %c0_49 = arith.constant 0 : index
    %28 = memref.load %arg5[%c6_48, %c0_49] : memref<8x2xf32, #tpu.memory_space<smem>>
    %c6_50 = arith.constant 6 : index
    %c1_51 = arith.constant 1 : index
    %29 = memref.load %arg5[%c6_50, %c1_51] : memref<8x2xf32, #tpu.memory_space<smem>>
    %c7_52 = arith.constant 7 : index
    %c0_53 = arith.constant 0 : index
    %30 = memref.load %arg5[%c7_52, %c0_53] : memref<8x2xf32, #tpu.memory_space<smem>>
    %c7_54 = arith.constant 7 : index
    %c1_55 = arith.constant 1 : index
    %31 = memref.load %arg5[%c7_54, %c1_55] : memref<8x2xf32, #tpu.memory_space<smem>>
    %c0_56 = arith.constant 0 : index
    %32 = memref.load %arg6[%c0_56] : memref<8xf32, #tpu.memory_space<smem>>
    %c1_57 = arith.constant 1 : index
    %33 = memref.load %arg6[%c1_57] : memref<8xf32, #tpu.memory_space<smem>>
    %c2_58 = arith.constant 2 : index
    %34 = memref.load %arg6[%c2_58] : memref<8xf32, #tpu.memory_space<smem>>
    %c3_59 = arith.constant 3 : index
    %35 = memref.load %arg6[%c3_59] : memref<8xf32, #tpu.memory_space<smem>>
    %c4_60 = arith.constant 4 : index
    %36 = memref.load %arg6[%c4_60] : memref<8xf32, #tpu.memory_space<smem>>
    %c5_61 = arith.constant 5 : index
    %37 = memref.load %arg6[%c5_61] : memref<8xf32, #tpu.memory_space<smem>>
    %c6_62 = arith.constant 6 : index
    %38 = memref.load %arg6[%c6_62] : memref<8xf32, #tpu.memory_space<smem>>
    %c7_63 = arith.constant 7 : index
    %39 = memref.load %arg6[%c7_63] : memref<8xf32, #tpu.memory_space<smem>>
    %c0_64 = arith.constant 0 : index
    %c0_65 = arith.constant 0 : index
    %40 = memref.load %arg7[%c0_64, %c0_65] : memref<2x8xf32, #tpu.memory_space<smem>>
    %c0_66 = arith.constant 0 : index
    %c1_67 = arith.constant 1 : index
    %41 = memref.load %arg7[%c0_66, %c1_67] : memref<2x8xf32, #tpu.memory_space<smem>>
    %c0_68 = arith.constant 0 : index
    %c2_69 = arith.constant 2 : index
    %42 = memref.load %arg7[%c0_68, %c2_69] : memref<2x8xf32, #tpu.memory_space<smem>>
    %c0_70 = arith.constant 0 : index
    %c3_71 = arith.constant 3 : index
    %43 = memref.load %arg7[%c0_70, %c3_71] : memref<2x8xf32, #tpu.memory_space<smem>>
    %c0_72 = arith.constant 0 : index
    %c4_73 = arith.constant 4 : index
    %44 = memref.load %arg7[%c0_72, %c4_73] : memref<2x8xf32, #tpu.memory_space<smem>>
    %c0_74 = arith.constant 0 : index
    %c5_75 = arith.constant 5 : index
    %45 = memref.load %arg7[%c0_74, %c5_75] : memref<2x8xf32, #tpu.memory_space<smem>>
    %c0_76 = arith.constant 0 : index
    %c6_77 = arith.constant 6 : index
    %46 = memref.load %arg7[%c0_76, %c6_77] : memref<2x8xf32, #tpu.memory_space<smem>>
    %c0_78 = arith.constant 0 : index
    %c7_79 = arith.constant 7 : index
    %47 = memref.load %arg7[%c0_78, %c7_79] : memref<2x8xf32, #tpu.memory_space<smem>>
    %c1_80 = arith.constant 1 : index
    %c0_81 = arith.constant 0 : index
    %48 = memref.load %arg7[%c1_80, %c0_81] : memref<2x8xf32, #tpu.memory_space<smem>>
    %c1_82 = arith.constant 1 : index
    %c1_83 = arith.constant 1 : index
    %49 = memref.load %arg7[%c1_82, %c1_83] : memref<2x8xf32, #tpu.memory_space<smem>>
    %c1_84 = arith.constant 1 : index
    %c2_85 = arith.constant 2 : index
    %50 = memref.load %arg7[%c1_84, %c2_85] : memref<2x8xf32, #tpu.memory_space<smem>>
    %c1_86 = arith.constant 1 : index
    %c3_87 = arith.constant 3 : index
    %51 = memref.load %arg7[%c1_86, %c3_87] : memref<2x8xf32, #tpu.memory_space<smem>>
    %c1_88 = arith.constant 1 : index
    %c4_89 = arith.constant 4 : index
    %52 = memref.load %arg7[%c1_88, %c4_89] : memref<2x8xf32, #tpu.memory_space<smem>>
    %c1_90 = arith.constant 1 : index
    %c5_91 = arith.constant 5 : index
    %53 = memref.load %arg7[%c1_90, %c5_91] : memref<2x8xf32, #tpu.memory_space<smem>>
    %c1_92 = arith.constant 1 : index
    %c6_93 = arith.constant 6 : index
    %54 = memref.load %arg7[%c1_92, %c6_93] : memref<2x8xf32, #tpu.memory_space<smem>>
    %c1_94 = arith.constant 1 : index
    %c7_95 = arith.constant 7 : index
    %55 = memref.load %arg7[%c1_94, %c7_95] : memref<2x8xf32, #tpu.memory_space<smem>>
    %c0_96 = arith.constant 0 : index
    %56 = memref.load %arg8[%c0_96] : memref<2xf32, #tpu.memory_space<smem>>
    %c1_97 = arith.constant 1 : index
    %57 = memref.load %arg8[%c1_97] : memref<2xf32, #tpu.memory_space<smem>>
    %58 = tpu.iota {dimensions = array<i32: 0>} : vector<16x128xi32>
    %c16_i32 = arith.constant 16 : i32
    %59 = arith.muli %arg0, %c16_i32 : i32
    %cst = arith.constant 0.000000e+00 : f32
    %60 = vector.broadcast %cst : f32 to vector<16x128xf32>
    %c0_98 = arith.constant 0 : index
    %c0_99 = arith.constant 0 : index
    %61 = vector.load %arg12[%c0_98, %c0_99] : memref<16x128xf32, #tpu.memory_space<vmem>>, vector<16x128xf32>
    tpu.vector_store %arg12[%c0_98, %c0_99], %60 {strides = array<i32>} : memref<16x128xf32, #tpu.memory_space<vmem>>, vector<16x128xf32>,
    %c0_i32 = arith.constant 0 : i32
    %c1_i32 = arith.constant 1 : i32
    %62 = arith.muli %c0_i32, %c1_i32 : i32
    %c0_i32_100 = arith.constant 0 : i32
    %63 = arith.addi %c0_i32_100, %62 : i32
    %c0_101 = arith.constant 0 : index
    %64 = arith.index_cast %63 : i32 to index
    %c0_102 = arith.constant 0 : index
    %c0_103 = arith.constant 0 : index
    %65 = vector.load %arg2[%c0_101, %64, %c0_102, %c0_103] : memref<2x1x16x128xf32, #tpu.memory_space<vmem>>, vector<1x1x16x128xf32>
    %66 = vector.shape_cast %65 : vector<1x1x16x128xf32> to vector<16x128xf32>
    %c1_104 = arith.constant 1 : index
    %67 = arith.index_cast %63 : i32 to index
    %c0_105 = arith.constant 0 : index
    %c0_106 = arith.constant 0 : index
    %68 = vector.load %arg2[%c1_104, %67, %c0_105, %c0_106] : memref<2x1x16x128xf32, #tpu.memory_space<vmem>>, vector<1x1x16x128xf32>
    %69 = vector.shape_cast %68 : vector<1x1x16x128xf32> to vector<16x128xf32>
    %c0_107 = arith.constant 0 : index
    %70 = arith.index_cast %63 : i32 to index
    %c0_108 = arith.constant 0 : index
    %c0_109 = arith.constant 0 : index
    %71 = vector.load %arg3[%c0_107, %70, %c0_108, %c0_109] : memref<2x1x16x128xbf16, #tpu.memory_space<vmem>>, vector<1x1x16x128xbf16>
    %72 = vector.shape_cast %71 : vector<1x1x16x128xbf16> to vector<16x128xbf16>
    %73 = arith.extf %72 : vector<16x128xbf16> to vector<16x128xf32>
    %c1_110 = arith.constant 1 : index
    %74 = arith.index_cast %63 : i32 to index
    %c0_111 = arith.constant 0 : index
    %c0_112 = arith.constant 0 : index
    %75 = vector.load %arg3[%c1_110, %74, %c0_111, %c0_112] : memref<2x1x16x128xbf16, #tpu.memory_space<vmem>>, vector<1x1x16x128xbf16>
    %76 = vector.shape_cast %75 : vector<1x1x16x128xbf16> to vector<16x128xbf16>
    %77 = arith.extf %76 : vector<16x128xbf16> to vector<16x128xf32>
    %c0_113 = arith.constant 0 : index
    %78 = arith.index_cast %63 : i32 to index
    %c0_114 = arith.constant 0 : index
    %c0_115 = arith.constant 0 : index
    %79 = vector.load %arg1[%c0_113, %78, %c0_114, %c0_115] : memref<2x1x16x128xf32, #tpu.memory_space<vmem>>, vector<1x1x16x128xf32>
    %80 = vector.shape_cast %79 : vector<1x1x16x128xf32> to vector<16x128xf32>
    %c1_116 = arith.constant 1 : index
    %81 = arith.index_cast %63 : i32 to index
    %c0_117 = arith.constant 0 : index
    %c0_118 = arith.constant 0 : index
    %82 = vector.load %arg1[%c1_116, %81, %c0_117, %c0_118] : memref<2x1x16x128xf32, #tpu.memory_space<vmem>>, vector<1x1x16x128xf32>
    %83 = vector.shape_cast %82 : vector<1x1x16x128xf32> to vector<16x128xf32>
    %84 = vector.broadcast %16 : f32 to vector<16x128xf32>
    %85 = arith.mulf %84, %66 : vector<16x128xf32>
    %86 = vector.broadcast %17 : f32 to vector<16x128xf32>
    %87 = arith.mulf %86, %69 : vector<16x128xf32>
    %88 = arith.addf %85, %87 : vector<16x128xf32>
    %89 = vector.broadcast %32 : f32 to vector<16x128xf32>
    %90 = arith.addf %88, %89 : vector<16x128xf32>
    %91 = vector.broadcast %18 : f32 to vector<16x128xf32>
    %92 = arith.mulf %91, %66 : vector<16x128xf32>
    %93 = vector.broadcast %19 : f32 to vector<16x128xf32>
    %94 = arith.mulf %93, %69 : vector<16x128xf32>
    %95 = arith.addf %92, %94 : vector<16x128xf32>
    %96 = vector.broadcast %33 : f32 to vector<16x128xf32>
    %97 = arith.addf %95, %96 : vector<16x128xf32>
    %98 = vector.broadcast %20 : f32 to vector<16x128xf32>
    %99 = arith.mulf %98, %66 : vector<16x128xf32>
    %100 = vector.broadcast %21 : f32 to vector<16x128xf32>
    %101 = arith.mulf %100, %69 : vector<16x128xf32>
    %102 = arith.addf %99, %101 : vector<16x128xf32>
    %103 = vector.broadcast %34 : f32 to vector<16x128xf32>
    %104 = arith.addf %102, %103 : vector<16x128xf32>
    %105 = vector.broadcast %22 : f32 to vector<16x128xf32>
    %106 = arith.mulf %105, %66 : vector<16x128xf32>
    %107 = vector.broadcast %23 : f32 to vector<16x128xf32>
    %108 = arith.mulf %107, %69 : vector<16x128xf32>
    %109 = arith.addf %106, %108 : vector<16x128xf32>
    %110 = vector.broadcast %35 : f32 to vector<16x128xf32>
    %111 = arith.addf %109, %110 : vector<16x128xf32>
    %112 = vector.broadcast %24 : f32 to vector<16x128xf32>
    %113 = arith.mulf %112, %66 : vector<16x128xf32>
    %114 = vector.broadcast %25 : f32 to vector<16x128xf32>
    %115 = arith.mulf %114, %69 : vector<16x128xf32>
    %116 = arith.addf %113, %115 : vector<16x128xf32>
    %117 = vector.broadcast %36 : f32 to vector<16x128xf32>
    %118 = arith.addf %116, %117 : vector<16x128xf32>
    %119 = vector.broadcast %26 : f32 to vector<16x128xf32>
    %120 = arith.mulf %119, %66 : vector<16x128xf32>
    %121 = vector.broadcast %27 : f32 to vector<16x128xf32>
    %122 = arith.mulf %121, %69 : vector<16x128xf32>
    %123 = arith.addf %120, %122 : vector<16x128xf32>
    %124 = vector.broadcast %37 : f32 to vector<16x128xf32>
    %125 = arith.addf %123, %124 : vector<16x128xf32>
    %126 = vector.broadcast %28 : f32 to vector<16x128xf32>
    %127 = arith.mulf %126, %66 : vector<16x128xf32>
    %128 = vector.broadcast %29 : f32 to vector<16x128xf32>
    %129 = arith.mulf %128, %69 : vector<16x128xf32>
    %130 = arith.addf %127, %129 : vector<16x128xf32>
    %131 = vector.broadcast %38 : f32 to vector<16x128xf32>
    %132 = arith.addf %130, %131 : vector<16x128xf32>
    %133 = vector.broadcast %30 : f32 to vector<16x128xf32>
    %134 = arith.mulf %133, %66 : vector<16x128xf32>
    %135 = vector.broadcast %31 : f32 to vector<16x128xf32>
    %136 = arith.mulf %135, %69 : vector<16x128xf32>
    %137 = arith.addf %134, %136 : vector<16x128xf32>
    %138 = vector.broadcast %39 : f32 to vector<16x128xf32>
    %139 = arith.addf %137, %138 : vector<16x128xf32>
    %140 = vector.broadcast %0 : f32 to vector<16x128xf32>
    %141 = arith.mulf %140, %80 : vector<16x128xf32>
    %142 = arith.addf %90, %141 : vector<16x128xf32>
    %143 = vector.broadcast %1 : f32 to vector<16x128xf32>
    %144 = arith.mulf %143, %83 : vector<16x128xf32>
    %145 = arith.addf %142, %144 : vector<16x128xf32>
    %146 = math.tanh %145 : vector<16x128xf32>
    %147 = vector.broadcast %2 : f32 to vector<16x128xf32>
    %148 = arith.mulf %147, %80 : vector<16x128xf32>
    %149 = arith.addf %97, %148 : vector<16x128xf32>
    %150 = vector.broadcast %3 : f32 to vector<16x128xf32>
    %151 = arith.mulf %150, %83 : vector<16x128xf32>
    %152 = arith.addf %149, %151 : vector<16x128xf32>
    %153 = math.tanh %152 : vector<16x128xf32>
    %154 = vector.broadcast %4 : f32 to vector<16x128xf32>
    %155 = arith.mulf %154, %80 : vector<16x128xf32>
    %156 = arith.addf %104, %155 : vector<16x128xf32>
    %157 = vector.broadcast %5 : f32 to vector<16x128xf32>
    %158 = arith.mulf %157, %83 : vector<16x128xf32>
    %159 = arith.addf %156, %158 : vector<16x128xf32>
    %160 = math.tanh %159 : vector<16x128xf32>
    %161 = vector.broadcast %6 : f32 to vector<16x128xf32>
    %162 = arith.mulf %161, %80 : vector<16x128xf32>
    %163 = arith.addf %111, %162 : vector<16x128xf32>
    %164 = vector.broadcast %7 : f32 to vector<16x128xf32>
    %165 = arith.mulf %164, %83 : vector<16x128xf32>
    %166 = arith.addf %163, %165 : vector<16x128xf32>
    %167 = math.tanh %166 : vector<16x128xf32>
    %168 = vector.broadcast %8 : f32 to vector<16x128xf32>
    %169 = arith.mulf %168, %80 : vector<16x128xf32>
    %170 = arith.addf %118, %169 : vector<16x128xf32>
    %171 = vector.broadcast %9 : f32 to vector<16x128xf32>
    %172 = arith.mulf %171, %83 : vector<16x128xf32>
    %173 = arith.addf %170, %172 : vector<16x128xf32>
    %174 = math.tanh %173 : vector<16x128xf32>
    %175 = vector.broadcast %10 : f32 to vector<16x128xf32>
    %176 = arith.mulf %175, %80 : vector<16x128xf32>
    %177 = arith.addf %125, %176 : vector<16x128xf32>
    %178 = vector.broadcast %11 : f32 to vector<16x128xf32>
    %179 = arith.mulf %178, %83 : vector<16x128xf32>
    %180 = arith.addf %177, %179 : vector<16x128xf32>
    %181 = math.tanh %180 : vector<16x128xf32>
    %182 = vector.broadcast %12 : f32 to vector<16x128xf32>
    %183 = arith.mulf %182, %80 : vector<16x128xf32>
    %184 = arith.addf %132, %183 : vector<16x128xf32>
    %185 = vector.broadcast %13 : f32 to vector<16x128xf32>
    %186 = arith.mulf %185, %83 : vector<16x128xf32>
    %187 = arith.addf %184, %186 : vector<16x128xf32>
    %188 = math.tanh %187 : vector<16x128xf32>
    %189 = vector.broadcast %14 : f32 to vector<16x128xf32>
    %190 = arith.mulf %189, %80 : vector<16x128xf32>
    %191 = arith.addf %139, %190 : vector<16x128xf32>
    %192 = vector.broadcast %15 : f32 to vector<16x128xf32>
    %193 = arith.mulf %192, %83 : vector<16x128xf32>
    %194 = arith.addf %191, %193 : vector<16x128xf32>
    %195 = math.tanh %194 : vector<16x128xf32>
    %196 = vector.broadcast %40 : f32 to vector<16x128xf32>
    %197 = arith.mulf %196, %146 : vector<16x128xf32>
    %198 = vector.broadcast %41 : f32 to vector<16x128xf32>
    %199 = arith.mulf %198, %153 : vector<16x128xf32>
    %200 = arith.addf %197, %199 : vector<16x128xf32>
    %201 = vector.broadcast %42 : f32 to vector<16x128xf32>
    %202 = arith.mulf %201, %160 : vector<16x128xf32>
    %203 = arith.addf %200, %202 : vector<16x128xf32>
    %204 = vector.broadcast %43 : f32 to vector<16x128xf32>
    %205 = arith.mulf %204, %167 : vector<16x128xf32>
    %206 = arith.addf %203, %205 : vector<16x128xf32>
    %207 = vector.broadcast %44 : f32 to vector<16x128xf32>
    %208 = arith.mulf %207, %174 : vector<16x128xf32>
    %209 = arith.addf %206, %208 : vector<16x128xf32>
    %210 = vector.broadcast %45 : f32 to vector<16x128xf32>
    %211 = arith.mulf %210, %181 : vector<16x128xf32>
    %212 = arith.addf %209, %211 : vector<16x128xf32>
    %213 = vector.broadcast %46 : f32 to vector<16x128xf32>
    %214 = arith.mulf %213, %188 : vector<16x128xf32>
    %215 = arith.addf %212, %214 : vector<16x128xf32>
    %216 = vector.broadcast %47 : f32 to vector<16x128xf32>
    %217 = arith.mulf %216, %195 : vector<16x128xf32>
    %218 = arith.addf %215, %217 : vector<16x128xf32>
    %219 = vector.broadcast %56 : f32 to vector<16x128xf32>
    %220 = arith.addf %218, %219 : vector<16x128xf32>
    %221 = vector.broadcast %48 : f32 to vector<16x128xf32>
    %222 = arith.mulf %221, %146 : vector<16x128xf32>
    %223 = vector.broadcast %49 : f32 to vector<16x128xf32>
    %224 = arith.mulf %223, %153 : vector<16x128xf32>
    %225 = arith.addf %222, %224 : vector<16x128xf32>
    %226 = vector.broadcast %50 : f32 to vector<16x128xf32>
    %227 = arith.mulf %226, %160 : vector<16x128xf32>
    %228 = arith.addf %225, %227 : vector<16x128xf32>
    %229 = vector.broadcast %51 : f32 to vector<16x128xf32>
    %230 = arith.mulf %229, %167 : vector<16x128xf32>
    %231 = arith.addf %228, %230 : vector<16x128xf32>
    %232 = vector.broadcast %52 : f32 to vector<16x128xf32>
    %233 = arith.mulf %232, %174 : vector<16x128xf32>
    %234 = arith.addf %231, %233 : vector<16x128xf32>
    %235 = vector.broadcast %53 : f32 to vector<16x128xf32>
    %236 = arith.mulf %235, %181 : vector<16x128xf32>
    %237 = arith.addf %234, %236 : vector<16x128xf32>
    %238 = vector.broadcast %54 : f32 to vector<16x128xf32>
    %239 = arith.mulf %238, %188 : vector<16x128xf32>
    %240 = arith.addf %237, %239 : vector<16x128xf32>
    %241 = vector.broadcast %55 : f32 to vector<16x128xf32>
    %242 = arith.mulf %241, %195 : vector<16x128xf32>
    %243 = arith.addf %240, %242 : vector<16x128xf32>
    %244 = vector.broadcast %57 : f32 to vector<16x128xf32>
    %245 = arith.addf %243, %244 : vector<16x128xf32>
    %246 = arith.mulf %80, %73 : vector<16x128xf32>
    %cst_119 = arith.constant 1.000000e+00 : f32
    %247 = vector.broadcast %cst_119 : f32 to vector<16x128xf32>
    %248 = arith.subf %247, %73 : vector<16x128xf32>
    %249 = arith.mulf %220, %248 : vector<16x128xf32>
    %250 = arith.addf %246, %249 : vector<16x128xf32>
    %251 = arith.mulf %83, %77 : vector<16x128xf32>
    %cst_120 = arith.constant 1.000000e+00 : f32
    %252 = vector.broadcast %cst_120 : f32 to vector<16x128xf32>
    %253 = arith.subf %252, %77 : vector<16x128xf32>
    %254 = arith.mulf %245, %253 : vector<16x128xf32>
    %255 = arith.addf %251, %254 : vector<16x128xf32>
    %256 = vector.broadcast %0 : f32 to vector<16x128xf32>
    %257 = arith.mulf %256, %250 : vector<16x128xf32>
    %258 = arith.addf %90, %257 : vector<16x128xf32>
    %259 = vector.broadcast %1 : f32 to vector<16x128xf32>
    %260 = arith.mulf %259, %255 : vector<16x128xf32>
    %261 = arith.addf %258, %260 : vector<16x128xf32>
    %262 = math.tanh %261 : vector<16x128xf32>
    %263 = vector.broadcast %2 : f32 to vector<16x128xf32>
    %264 = arith.mulf %263, %250 : vector<16x128xf32>
    %265 = arith.addf %97, %264 : vector<16x128xf32>
    %266 = vector.broadcast %3 : f32 to vector<16x128xf32>
    %267 = arith.mulf %266, %255 : vector<16x128xf32>
    %268 = arith.addf %265, %267 : vector<16x128xf32>
    %269 = math.tanh %268 : vector<16x128xf32>
    %270 = vector.broadcast %4 : f32 to vector<16x128xf32>
    %271 = arith.mulf %270, %250 : vector<16x128xf32>
    %272 = arith.addf %104, %271 : vector<16x128xf32>
    %273 = vector.broadcast %5 : f32 to vector<16x128xf32>
    %274 = arith.mulf %273, %255 : vector<16x128xf32>
    %275 = arith.addf %272, %274 : vector<16x128xf32>
    %276 = math.tanh %275 : vector<16x128xf32>
    %277 = vector.broadcast %6 : f32 to vector<16x128xf32>
    %278 = arith.mulf %277, %250 : vector<16x128xf32>
    %279 = arith.addf %111, %278 : vector<16x128xf32>
    %280 = vector.broadcast %7 : f32 to vector<16x128xf32>
    %281 = arith.mulf %280, %255 : vector<16x128xf32>
    %282 = arith.addf %279, %281 : vector<16x128xf32>
    %283 = math.tanh %282 : vector<16x128xf32>
    %284 = vector.broadcast %8 : f32 to vector<16x128xf32>
    %285 = arith.mulf %284, %250 : vector<16x128xf32>
    %286 = arith.addf %118, %285 : vector<16x128xf32>
    %287 = vector.broadcast %9 : f32 to vector<16x128xf32>
    %288 = arith.mulf %287, %255 : vector<16x128xf32>
    %289 = arith.addf %286, %288 : vector<16x128xf32>
    %290 = math.tanh %289 : vector<16x128xf32>
    %291 = vector.broadcast %10 : f32 to vector<16x128xf32>
    %292 = arith.mulf %291, %250 : vector<16x128xf32>
    %293 = arith.addf %125, %292 : vector<16x128xf32>
    %294 = vector.broadcast %11 : f32 to vector<16x128xf32>
    %295 = arith.mulf %294, %255 : vector<16x128xf32>
    %296 = arith.addf %293, %295 : vector<16x128xf32>
    %297 = math.tanh %296 : vector<16x128xf32>
    %298 = vector.broadcast %12 : f32 to vector<16x128xf32>
    %299 = arith.mulf %298, %250 : vector<16x128xf32>
    %300 = arith.addf %132, %299 : vector<16x128xf32>
    %301 = vector.broadcast %13 : f32 to vector<16x128xf32>
    %302 = arith.mulf %301, %255 : vector<16x128xf32>
    %303 = arith.addf %300, %302 : vector<16x128xf32>
    %304 = math.tanh %303 : vector<16x128xf32>
    %305 = vector.broadcast %14 : f32 to vector<16x128xf32>
    %306 = arith.mulf %305, %250 : vector<16x128xf32>
    %307 = arith.addf %139, %306 : vector<16x128xf32>
    %308 = vector.broadcast %15 : f32 to vector<16x128xf32>
    %309 = arith.mulf %308, %255 : vector<16x128xf32>
    %310 = arith.addf %307, %309 : vector<16x128xf32>
    %311 = math.tanh %310 : vector<16x128xf32>
    %312 = vector.broadcast %40 : f32 to vector<16x128xf32>
    %313 = arith.mulf %312, %262 : vector<16x128xf32>
    %314 = vector.broadcast %41 : f32 to vector<16x128xf32>
    %315 = arith.mulf %314, %269 : vector<16x128xf32>
    %316 = arith.addf %313, %315 : vector<16x128xf32>
    %317 = vector.broadcast %42 : f32 to vector<16x128xf32>
    %318 = arith.mulf %317, %276 : vector<16x128xf32>
    %319 = arith.addf %316, %318 : vector<16x128xf32>
    %320 = vector.broadcast %43 : f32 to vector<16x128xf32>
    %321 = arith.mulf %320, %283 : vector<16x128xf32>
    %322 = arith.addf %319, %321 : vector<16x128xf32>
    %323 = vector.broadcast %44 : f32 to vector<16x128xf32>
    %324 = arith.mulf %323, %290 : vector<16x128xf32>
    %325 = arith.addf %322, %324 : vector<16x128xf32>
    %326 = vector.broadcast %45 : f32 to vector<16x128xf32>
    %327 = arith.mulf %326, %297 : vector<16x128xf32>
    %328 = arith.addf %325, %327 : vector<16x128xf32>
    %329 = vector.broadcast %46 : f32 to vector<16x128xf32>
    %330 = arith.mulf %329, %304 : vector<16x128xf32>
    %331 = arith.addf %328, %330 : vector<16x128xf32>
    %332 = vector.broadcast %47 : f32 to vector<16x128xf32>
    %333 = arith.mulf %332, %311 : vector<16x128xf32>
    %334 = arith.addf %331, %333 : vector<16x128xf32>
    %335 = vector.broadcast %56 : f32 to vector<16x128xf32>
    %336 = arith.addf %334, %335 : vector<16x128xf32>
    %337 = vector.broadcast %48 : f32 to vector<16x128xf32>
    %338 = arith.mulf %337, %262 : vector<16x128xf32>
    %339 = vector.broadcast %49 : f32 to vector<16x128xf32>
    %340 = arith.mulf %339, %269 : vector<16x128xf32>
    %341 = arith.addf %338, %340 : vector<16x128xf32>
    %342 = vector.broadcast %50 : f32 to vector<16x128xf32>
    %343 = arith.mulf %342, %276 : vector<16x128xf32>
    %344 = arith.addf %341, %343 : vector<16x128xf32>
    %345 = vector.broadcast %51 : f32 to vector<16x128xf32>
    %346 = arith.mulf %345, %283 : vector<16x128xf32>
    %347 = arith.addf %344, %346 : vector<16x128xf32>
    %348 = vector.broadcast %52 : f32 to vector<16x128xf32>
    %349 = arith.mulf %348, %290 : vector<16x128xf32>
    %350 = arith.addf %347, %349 : vector<16x128xf32>
    %351 = vector.broadcast %53 : f32 to vector<16x128xf32>
    %352 = arith.mulf %351, %297 : vector<16x128xf32>
    %353 = arith.addf %350, %352 : vector<16x128xf32>
    %354 = vector.broadcast %54 : f32 to vector<16x128xf32>
    %355 = arith.mulf %354, %304 : vector<16x128xf32>
    %356 = arith.addf %353, %355 : vector<16x128xf32>
    %357 = vector.broadcast %55 : f32 to vector<16x128xf32>
    %358 = arith.mulf %357, %311 : vector<16x128xf32>
    %359 = arith.addf %356, %358 : vector<16x128xf32>
    %360 = vector.broadcast %57 : f32 to vector<16x128xf32>
    %361 = arith.addf %359, %360 : vector<16x128xf32>
    %362 = arith.mulf %250, %73 : vector<16x128xf32>
    %cst_121 = arith.constant 1.000000e+00 : f32
    %363 = vector.broadcast %cst_121 : f32 to vector<16x128xf32>
    %364 = arith.subf %363, %73 : vector<16x128xf32>
    %365 = arith.mulf %336, %364 : vector<16x128xf32>
    %366 = arith.addf %362, %365 : vector<16x128xf32>
    %367 = arith.mulf %255, %77 : vector<16x128xf32>
    %cst_122 = arith.constant 1.000000e+00 : f32
    %368 = vector.broadcast %cst_122 : f32 to vector<16x128xf32>
    %369 = arith.subf %368, %77 : vector<16x128xf32>
    %370 = arith.mulf %361, %369 : vector<16x128xf32>
    %371 = arith.addf %367, %370 : vector<16x128xf32>
    %372 = vector.broadcast %0 : f32 to vector<16x128xf32>
    %373 = arith.mulf %372, %366 : vector<16x128xf32>
    %374 = arith.addf %90, %373 : vector<16x128xf32>
    %375 = vector.broadcast %1 : f32 to vector<16x128xf32>
    %376 = arith.mulf %375, %371 : vector<16x128xf32>
    %377 = arith.addf %374, %376 : vector<16x128xf32>
    %378 = math.tanh %377 : vector<16x128xf32>
    %379 = vector.broadcast %2 : f32 to vector<16x128xf32>
    %380 = arith.mulf %379, %366 : vector<16x128xf32>
    %381 = arith.addf %97, %380 : vector<16x128xf32>
    %382 = vector.broadcast %3 : f32 to vector<16x128xf32>
    %383 = arith.mulf %382, %371 : vector<16x128xf32>
    %384 = arith.addf %381, %383 : vector<16x128xf32>
    %385 = math.tanh %384 : vector<16x128xf32>
    %386 = vector.broadcast %4 : f32 to vector<16x128xf32>
    %387 = arith.mulf %386, %366 : vector<16x128xf32>
    %388 = arith.addf %104, %387 : vector<16x128xf32>
    %389 = vector.broadcast %5 : f32 to vector<16x128xf32>
    %390 = arith.mulf %389, %371 : vector<16x128xf32>
    %391 = arith.addf %388, %390 : vector<16x128xf32>
    %392 = math.tanh %391 : vector<16x128xf32>
    %393 = vector.broadcast %6 : f32 to vector<16x128xf32>
    %394 = arith.mulf %393, %366 : vector<16x128xf32>
    %395 = arith.addf %111, %394 : vector<16x128xf32>
    %396 = vector.broadcast %7 : f32 to vector<16x128xf32>
    %397 = arith.mulf %396, %371 : vector<16x128xf32>
    %398 = arith.addf %395, %397 : vector<16x128xf32>
    %399 = math.tanh %398 : vector<16x128xf32>
    %400 = vector.broadcast %8 : f32 to vector<16x128xf32>
    %401 = arith.mulf %400, %366 : vector<16x128xf32>
    %402 = arith.addf %118, %401 : vector<16x128xf32>
    %403 = vector.broadcast %9 : f32 to vector<16x128xf32>
    %404 = arith.mulf %403, %371 : vector<16x128xf32>
    %405 = arith.addf %402, %404 : vector<16x128xf32>
    %406 = math.tanh %405 : vector<16x128xf32>
    %407 = vector.broadcast %10 : f32 to vector<16x128xf32>
    %408 = arith.mulf %407, %366 : vector<16x128xf32>
    %409 = arith.addf %125, %408 : vector<16x128xf32>
    %410 = vector.broadcast %11 : f32 to vector<16x128xf32>
    %411 = arith.mulf %410, %371 : vector<16x128xf32>
    %412 = arith.addf %409, %411 : vector<16x128xf32>
    %413 = math.tanh %412 : vector<16x128xf32>
    %414 = vector.broadcast %12 : f32 to vector<16x128xf32>
    %415 = arith.mulf %414, %366 : vector<16x128xf32>
    %416 = arith.addf %132, %415 : vector<16x128xf32>
    %417 = vector.broadcast %13 : f32 to vector<16x128xf32>
    %418 = arith.mulf %417, %371 : vector<16x128xf32>
    %419 = arith.addf %416, %418 : vector<16x128xf32>
    %420 = math.tanh %419 : vector<16x128xf32>
    %421 = vector.broadcast %14 : f32 to vector<16x128xf32>
    %422 = arith.mulf %421, %366 : vector<16x128xf32>
    %423 = arith.addf %139, %422 : vector<16x128xf32>
    %424 = vector.broadcast %15 : f32 to vector<16x128xf32>
    %425 = arith.mulf %424, %371 : vector<16x128xf32>
    %426 = arith.addf %423, %425 : vector<16x128xf32>
    %427 = math.tanh %426 : vector<16x128xf32>
    %428 = vector.broadcast %40 : f32 to vector<16x128xf32>
    %429 = arith.mulf %428, %378 : vector<16x128xf32>
    %430 = vector.broadcast %41 : f32 to vector<16x128xf32>
    %431 = arith.mulf %430, %385 : vector<16x128xf32>
    %432 = arith.addf %429, %431 : vector<16x128xf32>
    %433 = vector.broadcast %42 : f32 to vector<16x128xf32>
    %434 = arith.mulf %433, %392 : vector<16x128xf32>
    %435 = arith.addf %432, %434 : vector<16x128xf32>
    %436 = vector.broadcast %43 : f32 to vector<16x128xf32>
    %437 = arith.mulf %436, %399 : vector<16x128xf32>
    %438 = arith.addf %435, %437 : vector<16x128xf32>
    %439 = vector.broadcast %44 : f32 to vector<16x128xf32>
    %440 = arith.mulf %439, %406 : vector<16x128xf32>
    %441 = arith.addf %438, %440 : vector<16x128xf32>
    %442 = vector.broadcast %45 : f32 to vector<16x128xf32>
    %443 = arith.mulf %442, %413 : vector<16x128xf32>
    %444 = arith.addf %441, %443 : vector<16x128xf32>
    %445 = vector.broadcast %46 : f32 to vector<16x128xf32>
    %446 = arith.mulf %445, %420 : vector<16x128xf32>
    %447 = arith.addf %444, %446 : vector<16x128xf32>
    %448 = vector.broadcast %47 : f32 to vector<16x128xf32>
    %449 = arith.mulf %448, %427 : vector<16x128xf32>
    %450 = arith.addf %447, %449 : vector<16x128xf32>
    %451 = vector.broadcast %56 : f32 to vector<16x128xf32>
    %452 = arith.addf %450, %451 : vector<16x128xf32>
    %453 = vector.broadcast %48 : f32 to vector<16x128xf32>
    %454 = arith.mulf %453, %378 : vector<16x128xf32>
    %455 = vector.broadcast %49 : f32 to vector<16x128xf32>
    %456 = arith.mulf %455, %385 : vector<16x128xf32>
    %457 = arith.addf %454, %456 : vector<16x128xf32>
    %458 = vector.broadcast %50 : f32 to vector<16x128xf32>
    %459 = arith.mulf %458, %392 : vector<16x128xf32>
    %460 = arith.addf %457, %459 : vector<16x128xf32>
    %461 = vector.broadcast %51 : f32 to vector<16x128xf32>
    %462 = arith.mulf %461, %399 : vector<16x128xf32>
    %463 = arith.addf %460, %462 : vector<16x128xf32>
    %464 = vector.broadcast %52 : f32 to vector<16x128xf32>
    %465 = arith.mulf %464, %406 : vector<16x128xf32>
    %466 = arith.addf %463, %465 : vector<16x128xf32>
    %467 = vector.broadcast %53 : f32 to vector<16x128xf32>
    %468 = arith.mulf %467, %413 : vector<16x128xf32>
    %469 = arith.addf %466, %468 : vector<16x128xf32>
    %470 = vector.broadcast %54 : f32 to vector<16x128xf32>
    %471 = arith.mulf %470, %420 : vector<16x128xf32>
    %472 = arith.addf %469, %471 : vector<16x128xf32>
    %473 = vector.broadcast %55 : f32 to vector<16x128xf32>
    %474 = arith.mulf %473, %427 : vector<16x128xf32>
    %475 = arith.addf %472, %474 : vector<16x128xf32>
    %476 = vector.broadcast %57 : f32 to vector<16x128xf32>
    %477 = arith.addf %475, %476 : vector<16x128xf32>
    %478 = vector.broadcast %0 : f32 to vector<16x128xf32>
    %479 = arith.mulf %478, %452 : vector<16x128xf32>
    %480 = arith.addf %90, %479 : vector<16x128xf32>
    %481 = vector.broadcast %1 : f32 to vector<16x128xf32>
    %482 = arith.mulf %481, %477 : vector<16x128xf32>
    %483 = arith.addf %480, %482 : vector<16x128xf32>
    %484 = math.tanh %483 : vector<16x128xf32>
    %485 = vector.broadcast %2 : f32 to vector<16x128xf32>
    %486 = arith.mulf %485, %452 : vector<16x128xf32>
    %487 = arith.addf %97, %486 : vector<16x128xf32>
    %488 = vector.broadcast %3 : f32 to vector<16x128xf32>
    %489 = arith.mulf %488, %477 : vector<16x128xf32>
    %490 = arith.addf %487, %489 : vector<16x128xf32>
    %491 = math.tanh %490 : vector<16x128xf32>
    %492 = vector.broadcast %4 : f32 to vector<16x128xf32>
    %493 = arith.mulf %492, %452 : vector<16x128xf32>
    %494 = arith.addf %104, %493 : vector<16x128xf32>
    %495 = vector.broadcast %5 : f32 to vector<16x128xf32>
    %496 = arith.mulf %495, %477 : vector<16x128xf32>
    %497 = arith.addf %494, %496 : vector<16x128xf32>
    %498 = math.tanh %497 : vector<16x128xf32>
    %499 = vector.broadcast %6 : f32 to vector<16x128xf32>
    %500 = arith.mulf %499, %452 : vector<16x128xf32>
    %501 = arith.addf %111, %500 : vector<16x128xf32>
    %502 = vector.broadcast %7 : f32 to vector<16x128xf32>
    %503 = arith.mulf %502, %477 : vector<16x128xf32>
    %504 = arith.addf %501, %503 : vector<16x128xf32>
    %505 = math.tanh %504 : vector<16x128xf32>
    %506 = vector.broadcast %8 : f32 to vector<16x128xf32>
    %507 = arith.mulf %506, %452 : vector<16x128xf32>
    %508 = arith.addf %118, %507 : vector<16x128xf32>
    %509 = vector.broadcast %9 : f32 to vector<16x128xf32>
    %510 = arith.mulf %509, %477 : vector<16x128xf32>
    %511 = arith.addf %508, %510 : vector<16x128xf32>
    %512 = math.tanh %511 : vector<16x128xf32>
    %513 = vector.broadcast %10 : f32 to vector<16x128xf32>
    %514 = arith.mulf %513, %452 : vector<16x128xf32>
    %515 = arith.addf %125, %514 : vector<16x128xf32>
    %516 = vector.broadcast %11 : f32 to vector<16x128xf32>
    %517 = arith.mulf %516, %477 : vector<16x128xf32>
    %518 = arith.addf %515, %517 : vector<16x128xf32>
    %519 = math.tanh %518 : vector<16x128xf32>
    %520 = vector.broadcast %12 : f32 to vector<16x128xf32>
    %521 = arith.mulf %520, %452 : vector<16x128xf32>
    %522 = arith.addf %132, %521 : vector<16x128xf32>
    %523 = vector.broadcast %13 : f32 to vector<16x128xf32>
    %524 = arith.mulf %523, %477 : vector<16x128xf32>
    %525 = arith.addf %522, %524 : vector<16x128xf32>
    %526 = math.tanh %525 : vector<16x128xf32>
    %527 = vector.broadcast %14 : f32 to vector<16x128xf32>
    %528 = arith.mulf %527, %452 : vector<16x128xf32>
    %529 = arith.addf %139, %528 : vector<16x128xf32>
    %530 = vector.broadcast %15 : f32 to vector<16x128xf32>
    %531 = arith.mulf %530, %477 : vector<16x128xf32>
    %532 = arith.addf %529, %531 : vector<16x128xf32>
    %533 = math.tanh %532 : vector<16x128xf32>
    %534 = vector.broadcast %40 : f32 to vector<16x128xf32>
    %535 = arith.mulf %534, %484 : vector<16x128xf32>
    %536 = vector.broadcast %41 : f32 to vector<16x128xf32>
    %537 = arith.mulf %536, %491 : vector<16x128xf32>
    %538 = arith.addf %535, %537 : vector<16x128xf32>
    %539 = vector.broadcast %42 : f32 to vector<16x128xf32>
    %540 = arith.mulf %539, %498 : vector<16x128xf32>
    %541 = arith.addf %538, %540 : vector<16x128xf32>
    %542 = vector.broadcast %43 : f32 to vector<16x128xf32>
    %543 = arith.mulf %542, %505 : vector<16x128xf32>
    %544 = arith.addf %541, %543 : vector<16x128xf32>
    %545 = vector.broadcast %44 : f32 to vector<16x128xf32>
    %546 = arith.mulf %545, %512 : vector<16x128xf32>
    %547 = arith.addf %544, %546 : vector<16x128xf32>
    %548 = vector.broadcast %45 : f32 to vector<16x128xf32>
    %549 = arith.mulf %548, %519 : vector<16x128xf32>
    %550 = arith.addf %547, %549 : vector<16x128xf32>
    %551 = vector.broadcast %46 : f32 to vector<16x128xf32>
    %552 = arith.mulf %551, %526 : vector<16x128xf32>
    %553 = arith.addf %550, %552 : vector<16x128xf32>
    %554 = vector.broadcast %47 : f32 to vector<16x128xf32>
    %555 = arith.mulf %554, %533 : vector<16x128xf32>
    %556 = arith.addf %553, %555 : vector<16x128xf32>
    %557 = vector.broadcast %56 : f32 to vector<16x128xf32>
    %558 = arith.addf %556, %557 : vector<16x128xf32>
    %559 = vector.broadcast %48 : f32 to vector<16x128xf32>
    %560 = arith.mulf %559, %484 : vector<16x128xf32>
    %561 = vector.broadcast %49 : f32 to vector<16x128xf32>
    %562 = arith.mulf %561, %491 : vector<16x128xf32>
    %563 = arith.addf %560, %562 : vector<16x128xf32>
    %564 = vector.broadcast %50 : f32 to vector<16x128xf32>
    %565 = arith.mulf %564, %498 : vector<16x128xf32>
    %566 = arith.addf %563, %565 : vector<16x128xf32>
    %567 = vector.broadcast %51 : f32 to vector<16x128xf32>
    %568 = arith.mulf %567, %505 : vector<16x128xf32>
    %569 = arith.addf %566, %568 : vector<16x128xf32>
    %570 = vector.broadcast %52 : f32 to vector<16x128xf32>
    %571 = arith.mulf %570, %512 : vector<16x128xf32>
    %572 = arith.addf %569, %571 : vector<16x128xf32>
    %573 = vector.broadcast %53 : f32 to vector<16x128xf32>
    %574 = arith.mulf %573, %519 : vector<16x128xf32>
    %575 = arith.addf %572, %574 : vector<16x128xf32>
    %576 = vector.broadcast %54 : f32 to vector<16x128xf32>
    %577 = arith.mulf %576, %526 : vector<16x128xf32>
    %578 = arith.addf %575, %577 : vector<16x128xf32>
    %579 = vector.broadcast %55 : f32 to vector<16x128xf32>
    %580 = arith.mulf %579, %533 : vector<16x128xf32>
    %581 = arith.addf %578, %580 : vector<16x128xf32>
    %582 = vector.broadcast %57 : f32 to vector<16x128xf32>
    %583 = arith.addf %581, %582 : vector<16x128xf32>
    %cst_123 = arith.constant 1.000000e+00 : f32
    %584 = vector.broadcast %cst_123 : f32 to vector<16x128xf32>
    %585 = arith.mulf %584, %558 : vector<16x128xf32>
    %cst_124 = arith.constant 1.000000e+00 : f32
    %586 = vector.broadcast %cst_124 : f32 to vector<16x128xf32>
    %587 = arith.mulf %586, %73 : vector<16x128xf32>
    %588 = arith.mulf %587, %80 : vector<16x128xf32>
    %589 = arith.addf %585, %588 : vector<16x128xf32>
    %cst_125 = arith.constant 1.000000e+00 : f32
    %590 = vector.broadcast %cst_125 : f32 to vector<16x128xf32>
    %591 = arith.mulf %590, %73 : vector<16x128xf32>
    %cst_126 = arith.constant 1.000000e+00 : f32
    %592 = vector.broadcast %cst_126 : f32 to vector<16x128xf32>
    %593 = arith.addf %592, %591 : vector<16x128xf32>
    %594 = arith.mulf %593, %452 : vector<16x128xf32>
    %595 = arith.subf %594, %589 : vector<16x128xf32>
    %c0_127 = arith.constant 0 : index
    %596 = arith.index_cast %63 : i32 to index
    %c0_128 = arith.constant 0 : index
    %c0_129 = arith.constant 0 : index
    %597 = vector.load %arg9[%c0_127, %596, %c0_128, %c0_129] : memref<2x1x16x128xf32, #tpu.memory_space<vmem>>, vector<1x1x16x128xf32>
    %598 = vector.shape_cast %597 : vector<1x1x16x128xf32> to vector<16x128xf32>
    %599 = vector.shape_cast %452 : vector<16x128xf32> to vector<1x1x16x128xf32>
    tpu.vector_store %arg9[%c0_127, %596, %c0_128, %c0_129], %599 {strides = array<i32>} : memref<2x1x16x128xf32, #tpu.memory_space<vmem>>, vector<1x1x16x128xf32>,
    %c0_130 = arith.constant 0 : index
    %600 = arith.index_cast %63 : i32 to index
    %c0_131 = arith.constant 0 : index
    %c0_132 = arith.constant 0 : index
    %601 = vector.load %arg10[%c0_130, %600, %c0_131, %c0_132] : memref<2x1x16x128xf32, #tpu.memory_space<vmem>>, vector<1x1x16x128xf32>
    %602 = vector.shape_cast %601 : vector<1x1x16x128xf32> to vector<16x128xf32>
    %603 = vector.shape_cast %589 : vector<16x128xf32> to vector<1x1x16x128xf32>
    tpu.vector_store %arg10[%c0_130, %600, %c0_131, %c0_132], %603 {strides = array<i32>} : memref<2x1x16x128xf32, #tpu.memory_space<vmem>>, vector<1x1x16x128xf32>,
    %604 = arith.mulf %595, %595 : vector<16x128xf32>
    %cst_133 = arith.constant 1.000000e+00 : f32
    %605 = vector.broadcast %cst_133 : f32 to vector<16x128xf32>
    %606 = arith.mulf %605, %583 : vector<16x128xf32>
    %cst_134 = arith.constant 1.000000e+00 : f32
    %607 = vector.broadcast %cst_134 : f32 to vector<16x128xf32>
    %608 = arith.mulf %607, %77 : vector<16x128xf32>
    %609 = arith.mulf %608, %83 : vector<16x128xf32>
    %610 = arith.addf %606, %609 : vector<16x128xf32>
    %cst_135 = arith.constant 1.000000e+00 : f32
    %611 = vector.broadcast %cst_135 : f32 to vector<16x128xf32>
    %612 = arith.mulf %611, %77 : vector<16x128xf32>
    %cst_136 = arith.constant 1.000000e+00 : f32
    %613 = vector.broadcast %cst_136 : f32 to vector<16x128xf32>
    %614 = arith.addf %613, %612 : vector<16x128xf32>
    %615 = arith.mulf %614, %477 : vector<16x128xf32>
    %616 = arith.subf %615, %610 : vector<16x128xf32>
    %c1_137 = arith.constant 1 : index
    %617 = arith.index_cast %63 : i32 to index
    %c0_138 = arith.constant 0 : index
    %c0_139 = arith.constant 0 : index
    %618 = vector.load %arg9[%c1_137, %617, %c0_138, %c0_139] : memref<2x1x16x128xf32, #tpu.memory_space<vmem>>, vector<1x1x16x128xf32>
    %619 = vector.shape_cast %618 : vector<1x1x16x128xf32> to vector<16x128xf32>
    %620 = vector.shape_cast %477 : vector<16x128xf32> to vector<1x1x16x128xf32>
    tpu.vector_store %arg9[%c1_137, %617, %c0_138, %c0_139], %620 {strides = array<i32>} : memref<2x1x16x128xf32, #tpu.memory_space<vmem>>, vector<1x1x16x128xf32>,
    %c1_140 = arith.constant 1 : index
    %621 = arith.index_cast %63 : i32 to index
    %c0_141 = arith.constant 0 : index
    %c0_142 = arith.constant 0 : index
    %622 = vector.load %arg10[%c1_140, %621, %c0_141, %c0_142] : memref<2x1x16x128xf32, #tpu.memory_space<vmem>>, vector<1x1x16x128xf32>
    %623 = vector.shape_cast %622 : vector<1x1x16x128xf32> to vector<16x128xf32>
    %624 = vector.shape_cast %610 : vector<16x128xf32> to vector<1x1x16x128xf32>
    tpu.vector_store %arg10[%c1_140, %621, %c0_141, %c0_142], %624 {strides = array<i32>} : memref<2x1x16x128xf32, #tpu.memory_space<vmem>>, vector<1x1x16x128xf32>,
    %625 = arith.mulf %616, %616 : vector<16x128xf32>
    %626 = arith.addf %604, %625 : vector<16x128xf32>
    %c16_i32_143 = arith.constant 16 : i32
    %627 = arith.muli %63, %c16_i32_143 : i32
    %628 = arith.addi %59, %627 : i32
    %629 = vector.broadcast %628 : i32 to vector<16x128xi32>
    %630 = arith.addi %629, %58 : vector<16x128xi32>
    %c4_i32 = arith.constant 4 : i32
    %631 = vector.broadcast %c4_i32 : i32 to vector<16x128xi32>
    %632 = arith.cmpi slt, %630, %631 : vector<16x128xi32>
    %cst_144 = arith.constant 0.000000e+00 : f32
    %633 = vector.broadcast %cst_144 : f32 to vector<16x128xf32>
    %634 = arith.select %632, %626, %633 : vector<16x128xi1>, vector<16x128xf32>
    %c0_145 = arith.constant 0 : index
    %c0_146 = arith.constant 0 : index
    %635 = vector.load %arg12[%c0_145, %c0_146] : memref<16x128xf32, #tpu.memory_space<vmem>>, vector<16x128xf32>
    %636 = arith.addf %635, %634 : vector<16x128xf32>
    %c0_147 = arith.constant 0 : index
    %c0_148 = arith.constant 0 : index
    %637 = vector.load %arg12[%c0_147, %c0_148] : memref<16x128xf32, #tpu.memory_space<vmem>>, vector<16x128xf32>
    tpu.vector_store %arg12[%c0_147, %c0_148], %636 {strides = array<i32>} : memref<16x128xf32, #tpu.memory_space<vmem>>, vector<16x128xf32>,
    %c1_i32_149 = arith.constant 1 : i32
    %c0_150 = arith.constant 0 : index
    %c0_151 = arith.constant 0 : index
    %638 = vector.load %arg12[%c0_150, %c0_151] : memref<16x128xf32, #tpu.memory_space<vmem>>, vector<16x128xf32>
    %639 = vector.extract_strided_slice %638 {offsets = [0, 0], sizes = [8, 128], strides = [1, 1]} : vector<16x128xf32> to vector<8x128xf32>
    %640 = vector.extract_strided_slice %638 {offsets = [8, 0], sizes = [8, 128], strides = [1, 1]} : vector<16x128xf32> to vector<8x128xf32>
    %641 = arith.addf %639, %640 : vector<8x128xf32>
    %c0_152 = arith.constant 0 : index
    %c0_153 = arith.constant 0 : index
    %c0_154 = arith.constant 0 : index
    %642 = vector.load %arg11[%c0_152, %c0_153, %c0_154] : memref<1x8x128xf32, #tpu.memory_space<vmem>>, vector<1x8x128xf32>
    %643 = vector.shape_cast %642 : vector<1x8x128xf32> to vector<8x128xf32>
    %644 = vector.shape_cast %641 : vector<8x128xf32> to vector<1x8x128xf32>
    tpu.vector_store %arg11[%c0_152, %c0_153, %c0_154], %644 {strides = array<i32>} : memref<1x8x128xf32, #tpu.memory_space<vmem>>, vector<1x8x128xf32>,
    return
  }
  func.func @transform_0(%arg0: i32) -> (i32, i32, i32, i32) {
    %c0_i32 = arith.constant 0 : i32
    %c0_i32_0 = arith.constant 0 : i32
    %c0_i32_1 = arith.constant 0 : i32
    %c0_i32_2 = arith.constant 0 : i32
    return %c0_i32, %arg0, %c0_i32_0, %c0_i32_1 : i32, i32, i32, i32
  }
  func.func @transform_1(%arg0: i32) -> (i32, i32, i32, i32) {
    %c0_i32 = arith.constant 0 : i32
    %c0_i32_0 = arith.constant 0 : i32
    %c0_i32_1 = arith.constant 0 : i32
    %c0_i32_2 = arith.constant 0 : i32
    return %c0_i32, %arg0, %c0_i32_0, %c0_i32_1 : i32, i32, i32, i32
  }
  func.func @transform_2(%arg0: i32) -> (i32, i32, i32, i32) {
    %c0_i32 = arith.constant 0 : i32
    %c0_i32_0 = arith.constant 0 : i32
    %c0_i32_1 = arith.constant 0 : i32
    %c0_i32_2 = arith.constant 0 : i32
    return %c0_i32, %arg0, %c0_i32_0, %c0_i32_1 : i32, i32, i32, i32
  }
  func.func @transform_3(%arg0: i32) -> (i32, i32) {
    %c0_i32 = arith.constant 0 : i32
    %c0_i32_0 = arith.constant 0 : i32
    %c0_i32_1 = arith.constant 0 : i32
    return %c0_i32, %c0_i32_0 : i32, i32
  }
  func.func @transform_4(%arg0: i32) -> (i32, i32) {
    %c0_i32 = arith.constant 0 : i32
    %c0_i32_0 = arith.constant 0 : i32
    %c0_i32_1 = arith.constant 0 : i32
    return %c0_i32, %c0_i32_0 : i32, i32
  }
  func.func @transform_5(%arg0: i32) -> i32 {
    %c0_i32 = arith.constant 0 : i32
    %c0_i32_0 = arith.constant 0 : i32
    return %c0_i32 : i32
  }
  func.func @transform_6(%arg0: i32) -> (i32, i32) {
    %c0_i32 = arith.constant 0 : i32
    %c0_i32_0 = arith.constant 0 : i32
    %c0_i32_1 = arith.constant 0 : i32
    return %c0_i32, %c0_i32_0 : i32, i32
  }
  func.func @transform_7(%arg0: i32) -> i32 {
    %c0_i32 = arith.constant 0 : i32
    %c0_i32_0 = arith.constant 0 : i32
    return %c0_i32 : i32
  }
  func.func @transform_8(%arg0: i32) -> (i32, i32, i32, i32) {
    %c0_i32 = arith.constant 0 : i32
    %c0_i32_0 = arith.constant 0 : i32
    %c0_i32_1 = arith.constant 0 : i32
    %c0_i32_2 = arith.constant 0 : i32
    return %c0_i32, %arg0, %c0_i32_0, %c0_i32_1 : i32, i32, i32, i32
  }
  func.func @transform_9(%arg0: i32) -> (i32, i32, i32, i32) {
    %c0_i32 = arith.constant 0 : i32
    %c0_i32_0 = arith.constant 0 : i32
    %c0_i32_1 = arith.constant 0 : i32
    %c0_i32_2 = arith.constant 0 : i32
    return %c0_i32, %arg0, %c0_i32_0, %c0_i32_1 : i32, i32, i32, i32
  }
  func.func @transform_10(%arg0: i32) -> (i32, i32, i32) {
    %c0_i32 = arith.constant 0 : i32
    %c0_i32_0 = arith.constant 0 : i32
    %c0_i32_1 = arith.constant 0 : i32
    return %arg0, %c0_i32, %c0_i32_0 : i32, i32, i32
  }
}

</mosaic_0001>

<bundles_post_ra>
// kernel: tpu_custom_call.1
= control target key start
LH: loop header
LB: loop body
LE: loop exit
PB: predicated region body
PF: predicated region fallthrough
CT: control target
= control target key end

     0   :  { %s2513_s0 = inlined_call_operand.hbm [shape: f32[2,1,16,128], index: 0, kind: input, shape index: {}]   ;;  %s2514_s1 = inlined_call_operand.hbm [shape: f32[2,1,16,128], index: 1, kind: input, shape index: {}]   ;;  %s2515_s2 = inlined_call_operand.vmem [shape: bf16[2,1,16,128], index: 2, kind: input, shape index: {}]   ;;  %s2516_s3 = inlined_call_operand.vmem [shape: f32[8,2], index: 3, kind: input, shape index: {}]   ;;  %s2517_s4 = inlined_call_operand.vmem [shape: f32[8,2], index: 4, kind: input, shape index: {}]   ;;  %s2518_s5 = inlined_call_operand.vmem [shape: f32[8], index: 5, kind: input, shape index: {}]   ;;  %s2519_s6 = inlined_call_operand.vmem [shape: f32[2,8], index: 6, kind: input, shape index: {}]   ;;  %s2520_s7 = inlined_call_operand.vmem [shape: f32[2], index: 7, kind: input, shape index: {}]   ;;  %s2521_s8 = inlined_call_operand.hbm [shape: f32[2,1,16,128], index: 8, kind: output, shape index: {0}]   ;;  %s2522_s9 = inlined_call_operand.hbm [shape: f32[2,1,16,128], index: 9, kind: output, shape index: {1}]   ;;  %s2523_s10 = inlined_call_operand.hbm [shape: f32[1,8,128], index: 10, kind: output, shape index: {2}]  }
   0x1   :  { %2656 = sst [smem:[#allocation80_spill]] %s2521_s8 }
   0x2   :  { %2657 = sst [smem:[#allocation81_spill]] %s2522_s9 }
   0x3   :  { %2658 = sst [smem:[#allocation82_spill]] %s2523_s10 }
   0x4   :  { %16 = vsyncpa [#allocation4], 0 }
   0x5   :  { %17 = vsyncpa [#allocation8], 0 }
   0x6   :  { %18 = vsyncpa [#allocation6], 0 }
   0x7   :  { %19 = vsyncpa [#allocation11], 0 }
   0x8   :  { %20 = vsyncpa [#allocation14], 0 }
   0x9   :  { %21 = vsyncpa [#allocation5], 0  ;;  %s65_s15 = sshll.u32 %s2517_s4, 4  ;;  %s66_s15 = int_to_ptr.vmem [resolvable:$true] %s65_s15 }
   0xa   :  { %22 = vsyncpa [#allocation18], 0  ;;  %s85_s18 = sshll.u32 %s2519_s6, 4  ;;  %s1233_s19 = scalar_lea.vmem %s66_s15, 128  ;;  %s86_s18 = int_to_ptr.vmem [resolvable:$true] %s85_s18 }
   0xb   :  { %p1234_p0 = scmp.ne.s32.totalorder %s66_s15, %s1233_s19  ;;  %p1238_p1 = scmp.lt.s32.totalorder %s66_s15, %s66_s15 }
   0xc   :  { %p1239_p2 = scmp.lt.s32.totalorder %s1233_s19, %s1233_s19 }
   0xe   :  { %p1240_p3 = por %p1239_p2, %p1238_p1 }
  0x10   :  { %p1241_p4 = pnand %p1240_p3, %p1234_p0 }
  0x12   :  { %1244 = shalt.err (!%p1241_p4)
}
  0x13   :  { %s1417_s20 = smov [#allocation10]   ;;  %s1245_s21 = scalar_lea.vmem %s86_s18, 32 }
  0x14   :  { %68 = dma.vmem_to_smem %s66_s15, 128, %s1417_s20, [#allocation11]  }
  0x15   :  { %p1246_p5 = scmp.ne.s32.totalorder %s86_s18, %s1245_s21  ;;  %p1250_p6 = scmp.lt.s32.totalorder %s86_s18, %s86_s18 }
  0x16   :  { %p1251_p7 = scmp.lt.s32.totalorder %s1245_s21, %s1245_s21 }
  0x18   :  { %p1252_p8 = por %p1251_p7, %p1250_p6 }
  0x1a   :  { %p1253_p9 = pnand %p1252_p8, %p1246_p5 }
  0x1c   :  { %1256 = shalt.err (!%p1253_p9)
}
  0x1d   :  { %s1418_s4 = smov [#allocation13]   ;;  %s1419_s6 = smov [#allocation3]  }
  0x1e   :  { %88 = dma.vmem_to_smem %s86_s18, 32, %s1418_s4, [#allocation14]  }
  0x1f   :  { %s28_s22 = sshll.u32 %s1419_s6, 4  ;;  %s1257_s25 = scalar_lea.hbm %s2513_s0, 512  ;;  %s29_s22 = int_to_ptr.vmem [resolvable:$true] %s28_s22 }
  0x20   :  { %p1258_p10 = scmp.ne.s32.totalorder %s2513_s0, %s1257_s25  ;;  %p1261_p11 = scmp.lt.u32.totalorder %s1257_s25, %s2513_s0 }
  0x22   :  { %p1263_p12 = pnand %p1261_p11, %p1258_p10 }
  0x24   :  { %1266 = shalt.err (!%p1263_p12)
}
  0x25   :  { %s1267_s30 = scalar_lea.vmem %s29_s22, 512  ;;  %p1272_p0 = scmp.lt.s32.totalorder %s29_s22, %s29_s22 }
  0x26   :  { %p1268_p13 = scmp.ne.s32.totalorder %s29_s22, %s1267_s30  ;;  %p1273_p1 = scmp.lt.s32.totalorder %s1267_s30, %s1267_s30 }
  0x28   :  { %p1274_p2 = por %p1273_p1, %p1272_p0 }
  0x2a   :  { %p1275_p3 = pnand %p1274_p2, %p1268_p13 }
  0x2c   :  { %1278 = shalt.err (!%p1275_p3)
}
  0x2d   :  { %s2529_s11 = smov 128   ;;  %s2532_s12 = smov 8  }
  0x2e   :  { %34 = dma.hbm_to_vmem [thread:$0]  %s2513_s0, 512, %s29_s22, [#allocation4], %s2529_s11, %s2529_s11, %s2532_s12  }
  0x2f   :  { %s1422_s15 = smov [#allocation7]   ;;  %s55_s19 = sshll.u32 %s2516_s3, 4  ;;  %s56_s19 = int_to_ptr.vmem [resolvable:$true] %s55_s19 }
  0x30   :  { %s40_s16 = sshll.u32 %s1422_s15, 4  ;;  %s1279_s4 = scalar_lea.hbm %s2514_s1, 512  ;;  %s41_s16 = int_to_ptr.vmem [resolvable:$true] %s40_s16 }
  0x31   :  { %p1280_p4 = scmp.ne.s32.totalorder %s2514_s1, %s1279_s4  ;;  %p1283_p5 = scmp.lt.u32.totalorder %s1279_s4, %s2514_s1 }
  0x33   :  { %p1285_p6 = pnand %p1283_p5, %p1280_p4 }
  0x35   :  { %1288 = shalt.err (!%p1285_p6)
}
  0x36   :  { %s1289_s0 = scalar_lea.vmem %s41_s16, 512  ;;  %p1294_p8 = scmp.lt.s32.totalorder %s41_s16, %s41_s16 }
  0x37   :  { %p1290_p7 = scmp.ne.s32.totalorder %s41_s16, %s1289_s0  ;;  %p1295_p9 = scmp.lt.s32.totalorder %s1289_s0, %s1289_s0 }
  0x39   :  { %p1296_p10 = por %p1295_p9, %p1294_p8 }
  0x3b   :  { %p1297_p11 = pnand %p1296_p10, %p1290_p7 }
  0x3d   :  { %1300 = shalt.err (!%p1297_p11)
}
  0x3e   :  { %46 = dma.hbm_to_vmem [thread:$0]  %s2514_s1, 512, %s41_s16, [#allocation8], %s2529_s11, %s2529_s11, %s2532_s12  }
  0x3f   :  { %s75_s28 = sshll.u32 %s2518_s5, 4  ;;  %s1301_s29 = scalar_lea.vmem %s56_s19, 128  ;;  %s76_s28 = int_to_ptr.vmem [resolvable:$true] %s75_s28 }
  0x40   :  { %p1302_p12 = scmp.ne.s32.totalorder %s56_s19, %s1301_s29  ;;  %p1306_p13 = scmp.lt.s32.totalorder %s56_s19, %s56_s19 }
  0x41   :  { %p1307_p0 = scmp.lt.s32.totalorder %s1301_s29, %s1301_s29 }
  0x43   :  { %p1308_p1 = por %p1307_p0, %p1306_p13 }
  0x45   :  { %p1309_p2 = pnand %p1308_p1, %p1302_p12 }
  0x47   :  { %1312 = shalt.err (!%p1309_p2)
}
  0x48   :  { %s1423_s30 = smov [#allocation9]   ;;  %s1313_s13 = scalar_lea.vmem %s76_s28, 16 }
  0x49   :  { %58 = dma.vmem_to_smem %s56_s19, 128, %s1423_s30, [#allocation6]  }
  0x4a   :  { %p1314_p3 = scmp.ne.s32.totalorder %s76_s28, %s1313_s13  ;;  %p1318_p4 = scmp.lt.s32.totalorder %s76_s28, %s76_s28 }
  0x4b   :  { %p1319_p5 = scmp.lt.s32.totalorder %s1313_s13, %s1313_s13 }
  0x4d   :  { %p1320_p6 = por %p1319_p5, %p1318_p4 }
  0x4f   :  { %p1321_p7 = pnand %p1320_p6, %p1314_p3 }
  0x51   :  { %1324 = shalt.err (!%p1321_p7)
}
  0x52   :  { %s1424_s1 = smov [#allocation12]   ;;  %s95_s15 = sshll.u32 %s2520_s7, 4  ;;  %s96_s15 = int_to_ptr.vmem [resolvable:$true] %s95_s15 }
  0x53   :  { %78 = dma.vmem_to_smem %s76_s28, 16, %s1424_s1, [#allocation11]  }
  0x54   :  { %s1325_s16 = scalar_lea.vmem %s96_s15, 16  ;;  %p1330_p9 = scmp.lt.s32.totalorder %s96_s15, %s96_s15 }
  0x55   :  { %p1326_p8 = scmp.ne.s32.totalorder %s96_s15, %s1325_s16  ;;  %p1331_p10 = scmp.lt.s32.totalorder %s1325_s16, %s1325_s16 }
  0x57   :  { %p1332_p11 = por %p1331_p10, %p1330_p9 }
  0x59   :  { %p1333_p12 = pnand %p1332_p11, %p1326_p8 }
  0x5b   :  { %1336 = shalt.err (!%p1333_p12)
}
  0x5c   :  { %s1425_s17 = smov [#allocation15]  }
  0x5d   :  { %98 = dma.vmem_to_smem %s96_s15, 16, %s1425_s17, [#allocation14]  }
  0x5e   :  { %1403 = dma.done.wait [#allocation4], 512  }
  0x5f   :  { %1404 = vsyncadd [#allocation4], 4294966784 }
  0x60   :  { %1405 = dma.done.wait [#allocation8], 512  }
  0x61   :  { %1406 = vsyncadd [#allocation8], 4294966784 }
  0x62   :  { %1407 = dma.done.wait [#allocation6], 128  }
  0x63   :  { %1408 = vsyncadd [#allocation6], 4294967168 }
  0x64   :  { %1409 = dma.done.wait [#allocation11], 144  }
  0x65   :  { %1410 = vsyncadd [#allocation11], 4294967152 }
  0x66   :  { %1411 = dma.done.wait [#allocation14], 48  }
  0x67   :  { %1412 = vsyncadd [#allocation14], 4294967248 }
  0x68   :  { %120 = sfence }
  0x69   :  { %s121_s7 = sld [smem:[#allocation9]]  ;;  %s1029_s18 = sld [smem:[#allocation9 + $0x1]]  ;;  %v1532_v0 = vld [vmem:[%s2515_s2] sm:$0xff]   ;;  %v1544_v2 = vld [vmem:[%s2515_s2 + $0x8] sm:$0xff]   ;;  %v1554_v4 = vld [vmem:[#allocation3 + $0x10] sm:$0xff] }
  0x6a   :  { %s1030_s19 = sld [smem:[#allocation9 + $0x80]]  ;;  %s1031_s20 = sld [smem:[#allocation9 + $0x81]]  ;;  %2659 = vst [vmem:[#allocation27_spill] sm:$0xff] %v1532_v0  ;;  %v1539_v1 = vunpack.c.l.bf16 %v1532_v0  ;;  %2661 = vst [vmem:[#allocation29_spill] sm:$0xff] %v1544_v2  ;;  %v199_v3 = vld [vmem:[#allocation3] sm:$0xff]  ;;  %v1561_v5 = vunpack.c.l.bf16 %v1544_v2  ;;  %v1654_v30 = vld [vmem:[#allocation7 + $0x10] sm:$0xff] }
  0x6b   :  { %s1032_s6 = sld [smem:[#allocation9 + $0x100]]  ;;  %s1033_s23 = sld [smem:[#allocation9 + $0x101]]  ;;  %v1652_v29 = vld [vmem:[#allocation7] sm:$0xff] }
  0x6c   :  { %s1534_s24 = sld [smem:[#allocation9 + $0x180]]  ;;  %s1536_s25 = sld [smem:[#allocation9 + $0x181]]  ;;  %2660 = vst [vmem:[#allocation28_spill] sm:$0xff] %v1539_v1  ;;  %2662 = vst [vmem:[#allocation30_spill] sm:$0xff] %v1561_v5  ;;  %v1568_v8 = vmul.f32 %v1539_v1, %v199_v3 }
  0x6d   :  { %s1546_s22 = sld [smem:[#allocation9 + $0x200]]  ;;  %s1548_s26 = sld [smem:[#allocation9 + $0x201]] }
  0x6e   :  { %s1550_s27 = sld [smem:[#allocation9 + $0x280]]  ;;  %s1552_s28 = sld [smem:[#allocation9 + $0x281]]  ;;  %2664 = vst [vmem:[#allocation32_spill] sm:$0xff] %v1568_v8 }
  0x6f   :  { %s1556_s29 = sld [smem:[#allocation9 + $0x300]]  ;;  %s1558_s30 = sld [smem:[#allocation9 + $0x301]]  ;;  %v1563_v6 = vstv %s121_s7  ;;  %v1565_v7 = vstv %s1029_s18 }
  0x70   :  { %2663 = vst [vmem:[#allocation31_spill] sm:$0xff] %v1565_v7  ;;  %s1570_s2 = sld [smem:[#allocation9 + $0x380]]  ;;  %s1572_s13 = sld [smem:[#allocation9 + $0x381]]  ;;  %v1575_v9 = vmul.f32 %v1563_v6, %v199_v3  ;;  %v1577_v10 = vstv %s1030_s19  ;;  %v1579_v11 = vstv %s1031_s20  ;;  %v1588_v13 = vmul.f32 %v1565_v7, %v1554_v4 }
  0x71   :  { %2665 = vst [vmem:[#allocation33_spill] sm:$0xff] %v1577_v10  ;;  %2666 = vst [vmem:[#allocation34_spill] sm:$0xff] %v1579_v11  ;;  %s1582_s1 = sld [smem:[#allocation10]]  ;;  %s1584_s5 = sld [smem:[#allocation10 + $0x1]]  ;;  %v1591_v14 = vmul.f32 %v1577_v10, %v199_v3  ;;  %v1593_v15 = vstv %s1032_s6  ;;  %v1595_v16 = vstv %s1033_s23  ;;  %v1603_v17 = vmul.f32 %v1579_v11, %v1554_v4 }
  0x72   :  { %2667 = vst [vmem:[#allocation35_spill] sm:$0xff] %v1593_v15  ;;  %2668 = vst [vmem:[#allocation36_spill] sm:$0xff] %v1595_v16  ;;  %s1597_s14 = sld [smem:[#allocation10 + $0x80]]  ;;  %s1599_s15 = sld [smem:[#allocation10 + $0x81]]  ;;  %v1606_v18 = vmul.f32 %v1593_v15, %v199_v3  ;;  %v1609_v19 = vstv %s1534_s24  ;;  %v1612_v20 = vstv %s1536_s25  ;;  %v1620_v21 = vmul.f32 %v1595_v16, %v1554_v4 }
  0x73   :  { %2669 = vst [vmem:[#allocation37_spill] sm:$0xff] %v1609_v19  ;;  %s1614_s16 = sld [smem:[#allocation10 + $0x100]]  ;;  %s1616_s17 = sld [smem:[#allocation10 + $0x101]]  ;;  %v1623_v22 = vmul.f32 %v1609_v19, %v199_v3  ;;  %v1626_v23 = vstv %s1546_s22  ;;  %v1629_v24 = vstv %s1548_s26  ;;  %v1637_v25 = vmul.f32 %v1612_v20, %v1554_v4 }
  0x74   :  { %s1631_s7 = sld [smem:[#allocation10 + $0x180]]  ;;  %s1633_s18 = sld [smem:[#allocation10 + $0x181]]  ;;  %v1640_v26 = vmul.f32 %v1626_v23, %v199_v3  ;;  %v1643_v27 = vstv %s1550_s27  ;;  %v1646_v28 = vstv %s1552_s28  ;;  %v1658_v31 = vmul.f32 %v1629_v24, %v1554_v4 }
  0x75   :  { %2670 = vst [vmem:[#allocation38_spill] sm:$0xff] %v1643_v27  ;;  %s1648_s19 = sld [smem:[#allocation10 + $0x200]]  ;;  %s1650_s20 = sld [smem:[#allocation10 + $0x201]]  ;;  %v1661_v32 = vmul.f32 %v1643_v27, %v199_v3  ;;  %v1664_v33 = vstv %s1556_s29  ;;  %v1667_v34 = vstv %s1558_s30  ;;  %v1675_v35 = vmul.f32 %v1646_v28, %v1554_v4 }
  0x76   :  { %2671 = vst [vmem:[#allocation39_spill] sm:$0xff] %v1667_v34  ;;  %s1669_s21 = sld [smem:[#allocation10 + $0x280]]  ;;  %s1671_s4 = sld [smem:[#allocation10 + $0x281]]  ;;  %v1678_v36 = vmul.f32 %v1664_v33, %v199_v3  ;;  %v1682_v37 = vmul.f32 %v1667_v34, %v1554_v4  ;;  %v1685_v38 = vstv %s1570_s2  ;;  %v1697_v42 = vstv %s1572_s13 }
  0x77   :  { %2674 = vst [vmem:[#allocation42_spill] sm:$0xff] %v1685_v38  ;;  %s1687_s6 = sld [smem:[#allocation10 + $0x300]]  ;;  %s1689_s23 = sld [smem:[#allocation10 + $0x301]]  ;;  %v204_v39 = vstv %s1582_s1  ;;  %v207_v40 = vstv %s1584_s5  ;;  %v1694_v41 = vmul.f32 %v1685_v38, %v199_v3  ;;  %2677 = vst [vmem:[#allocation45_spill] sm:$0xff] %v1697_v42 }
  0x78   :  { %s1699_s24 = sld [smem:[#allocation10 + $0x380]]  ;;  %s1701_s25 = sld [smem:[#allocation10 + $0x381]]  ;;  %v205_v43 = vmul.f32 %v204_v39, %v1652_v29  ;;  %v208_v44 = vmul.f32 %v207_v40, %v1654_v30  ;;  %v215_v45 = vstv %s1597_s14  ;;  %v218_v46 = vstv %s1599_s15 }
  0x79   :  { %s1711_s0 = sld [smem:[#allocation12]]  ;;  %s1713_s3 = sld [smem:[#allocation12 + $0x1]]  ;;  %v216_v47 = vmul.f32 %v215_v45, %v1652_v29  ;;  %v219_v48 = vmul.f32 %v218_v46, %v1654_v30  ;;  %v226_v49 = vstv %s1614_s16  ;;  %v229_v50 = vstv %s1616_s17 }
  0x7a   :  { %s1723_s22 = sld [smem:[#allocation12 + $0x2]]  ;;  %s1725_s26 = sld [smem:[#allocation12 + $0x3]]  ;;  %v210_v51 = vadd.f32 %v208_v44, %v205_v43  ;;  %v227_v52 = vmul.f32 %v226_v49, %v1652_v29  ;;  %v230_v53 = vmul.f32 %v229_v50, %v1654_v30  ;;  %v237_v54 = vstv %s1631_s7 }
  0x7b   :  { %s1734_s27 = sld [smem:[#allocation12 + $0x4]]  ;;  %s1736_s28 = sld [smem:[#allocation12 + $0x5]]  ;;  %v221_v55 = vadd.f32 %v219_v48, %v216_v47  ;;  %v238_v56 = vmul.f32 %v237_v54, %v1652_v29  ;;  %v2526_v57 = vstv %s1633_s18  ;;  %v2524_v58 = vstv %s1648_s19 }
  0x7c   :  { %2672 = sst [smem:[#allocation40_spill]] %s1669_s21  ;;  %s1743_s29 = sld [smem:[#allocation12 + $0x6]]  ;;  %v232_v59 = vadd.f32 %v230_v53, %v227_v52  ;;  %v241_v60 = vmul.f32 %v2526_v57, %v1654_v30  ;;  %v249_v61 = vmul.f32 %v2524_v58, %v1652_v29  ;;  %v2525_v62 = vstv %s1650_s20 }
  0x7d   :  { %2673 = sst [smem:[#allocation41_spill]] %s1671_s4  ;;  %s1745_s30 = sld [smem:[#allocation12 + $0x7]]  ;;  %v252_v63 = vmul.f32 %v2525_v62, %v1654_v30  ;;  %v2528_v3 = vstv %s1669_s21  ;;  %v2527_v43 = vstv %s1671_s4  ;;  %v2531_v44 = vstv %s1687_s6 }
  0x7e   :  { %2675 = sst [smem:[#allocation43_spill]] %s1687_s6  ;;  %v243_v47 = vadd.f32 %v241_v60, %v238_v56  ;;  %v260_v48 = vmul.f32 %v2528_v3, %v1652_v29  ;;  %v263_v52 = vmul.f32 %v2527_v43, %v1654_v30  ;;  %v271_v53 = vmul.f32 %v2531_v44, %v1652_v29  ;;  %s1772_s2 = sld [smem:[#allocation13]] }
  0x7f   :  { %2676 = sst [smem:[#allocation44_spill]] %s1689_s23  ;;  %v2536_v12 = vstv %s1711_s0  ;;  %v2535_v58 = vstv %s1713_s3  ;;  %v254_v62 = vadd.f32 %v252_v63, %v249_v61  ;;  %v2543_v57 = vstv %s1689_s23  ;;  %s1784_s13 = sld [smem:[#allocation13 + $0x1]] }
  0x80   :  { %2678 = sst [smem:[#allocation46_spill]] %s1699_s24  ;;  %v1776_v56 = vadd.f32 %v2536_v12, %v210_v51  ;;  %v1780_v60 = vadd.f32 %v2535_v58, %v221_v55  ;;  %v2544_v43 = vstv %s1723_s22  ;;  %v2539_v3 = vstv %s1725_s26  ;;  %s1786_s11 = sld [smem:[#allocation13 + $0x2]] }
  0x81   :  { %2679 = sst [smem:[#allocation47_spill]] %s1701_s25  ;;  %v1790_v61 = vadd.f32 %v2544_v43, %v232_v59  ;;  %v1794_v63 = vadd.f32 %v2539_v3, %v243_v47  ;;  %v2542_v51 = vstv %s1734_s27  ;;  %v265_v44 = vadd.f32 %v263_v52, %v260_v48  ;;  %s1797_s12 = sld [smem:[#allocation13 + $0x3]] }
  0x82   :  { %2680 = sst [smem:[#allocation48_spill]] %s1725_s26  ;;  %s1799_s10 = sld [smem:[#allocation13 + $0x4]]  ;;  %v1803_v55 = vadd.f32 %v2542_v51, %v254_v62  ;;  %v2549_v58 = vstv %s1736_s28  ;;  %v274_v12 = vmul.f32 %v2543_v57, %v1654_v30  ;;  %v2556_v59 = vstv %s1743_s29 }
  0x83   :  { %2681 = sst [smem:[#allocation49_spill]] %s1734_s27  ;;  %s1810_s9 = sld [smem:[#allocation13 + $0x5]]  ;;  %v1816_v47 = vadd.f32 %v2549_v58, %v265_v44  ;;  %v2558_v48 = vstv %s1699_s24  ;;  %v2557_v52 = vstv %s1701_s25  ;;  %v2555_v3 = vstv %s1745_s30 }
  0x84   :  { %2682 = sst [smem:[#allocation50_spill]] %s1736_s28  ;;  %2685 = vst [vmem:[#allocation53_spill] sm:$0xff] %v1803_v55  ;;  %s1812_s8 = sld [smem:[#allocation13 + $0x6]]  ;;  %v276_v62 = vadd.f32 %v274_v12, %v271_v53  ;;  %v282_v51 = vmul.f32 %v2558_v48, %v1652_v29  ;;  %v285_v57 = vmul.f32 %v2557_v52, %v1654_v30  ;;  %v295_v43 = vadd.f32 %v1575_v9, %v1776_v56 }
  0x85   :  { %2683 = sst [smem:[#allocation51_spill]] %s1743_s29  ;;  %2686 = vst [vmem:[#allocation54_spill] sm:$0xff] %v1816_v47  ;;  %s1821_s6 = sld [smem:[#allocation13 + $0x7]]  ;;  %v307_v44 = vadd.f32 %v1591_v14, %v1780_v60  ;;  %v319_v12 = vadd.f32 %v1606_v18, %v1790_v61  ;;  %v331_v29 = vadd.f32 %v1623_v22, %v1794_v63  ;;  %v343_v30 = vadd.f32 %v1640_v26, %v1803_v55 }
  0x86   :  { %2684 = sst [smem:[#allocation52_spill]] %s1745_s30  ;;  %s1823_s27 = sld [smem:[#allocation13 + $0x80]]  ;;  %v1851_v9 = vadd.f32 %v2556_v59, %v276_v62  ;;  %v287_v53 = vadd.f32 %v285_v57, %v282_v51  ;;  %v300_v14 = vadd.f32 %v1588_v13, %v295_v43  ;;  %v355_v58 = vadd.f32 %v1661_v32, %v1816_v47 }
  0x87   :  { %s1833_s28 = sld [smem:[#allocation13 + $0x81]]  ;;  %s1835_s23 = sld [smem:[#allocation15]]  ;;  %v312_v18 = vadd.f32 %v1603_v17, %v307_v44  ;;  %v324_v22 = vadd.f32 %v1620_v21, %v319_v12  ;;  %v336_v26 = vadd.f32 %v1637_v25, %v331_v29  ;;  %v382_v62 = vmul.f32 %v1697_v42, %v1554_v4 }
  0x88   :  { %s1845_s25 = sld [smem:[#allocation13 + $0x82]]  ;;  %s1847_s24 = sld [smem:[#allocation13 + $0x83]]  ;;  %2687 = vst [vmem:[#allocation55_spill] sm:$0xff] %v1851_v9  ;;  %v1867_v13 = vadd.f32 %v2555_v3, %v287_v53  ;;  %1105 = vtanh.f32 %v300_v14  ;;  %v348_v32 = vadd.f32 %v1658_v31, %v343_v30  ;;  %v367_v17 = vadd.f32 %v1678_v36, %v1851_v9  ;;  %v1914_v30 = vld [vmem:[#allocation7 + $0x8] sm:$0xff]  ;;  %v1916_v53 = vld [vmem:[#allocation7 + $0x18] sm:$0xff] }
  0x89   :  { %s1856_s4 = sld [smem:[#allocation13 + $0x84]]  ;;  %s1858_s21 = sld [smem:[#allocation13 + $0x85]]  ;;  %1107 = vtanh.f32 %v312_v18  ;;  %v360_v21 = vadd.f32 %v1675_v35, %v355_v58  ;;  %v1875_v25 = vmul.f32 %v1561_v5, %v1554_v4  ;;  %v1886_v36 = vstv %s1772_s2 }
  0x8a   :  { %2688 = vst [vmem:[#allocation56_spill] sm:$0xff] %v1867_v13  ;;  %s1878_s30 = sld [smem:[#allocation13 + $0x86]]  ;;  %s1880_s29 = sld [smem:[#allocation13 + $0x87]]  ;;  %1109 = vtanh.f32 %v324_v22  ;;  %v372_v31 = vadd.f32 %v1682_v37, %v367_v17  ;;  %v379_v35 = vadd.f32 %v1694_v41, %v1867_v13  ;;  %2690 = vst [vmem:[#allocation58_spill] sm:$0xff] %v1886_v36  ;;  %v1889_v4 = vstv %s1784_s13 }
  0x8b   :  { %2689 = vst [vmem:[#allocation57_spill] sm:$0xff] %v1875_v25  ;;  %1111 = vtanh.f32 %v336_v26  ;;  %2691 = vst [vmem:[#allocation59_spill] sm:$0xff] %v1889_v4  ;;  %v1892_v58 = vstv %s1786_s11  ;;  %v1895_v43 = vstv %s1797_s12  ;;  %s1897_s26 = sld [smem:[#allocation15 + $0x1]]  ;;  %v1900_v41 = vstv %s1799_s10  ;;  %s2717_s11 = sld [smem:[#allocation43_spill]] }
  0x8c   :  { %2692 = vst [vmem:[#allocation60_spill] sm:$0xff] %v1892_v58  ;;  %1113 = vtanh.f32 %v348_v32  ;;  %v384_v37 = vadd.f32 %v382_v62, %v379_v35  ;;  %2693 = vst [vmem:[#allocation61_spill] sm:$0xff] %v1900_v41  ;;  %v1903_v51 = vstv %s1810_s9  ;;  %v1906_v44 = vstv %s1812_s8  ;;  %s2703_s8 = sld [smem:[#allocation48_spill]]  ;;  %s2705_s9 = sld [smem:[#allocation40_spill]] }
  0x8d   :  { %2694 = vst [vmem:[#allocation62_spill] sm:$0xff] %v1903_v51  ;;  %1115 = vtanh.f32 %v360_v21  ;;  %v1909_v12 = vstv %s1821_s6  ;;  %v1912_v29 = vstv %s1835_s23  ;;  %v1919_v14 = vstv %s1823_s27  ;;  %s2709_s10 = sld [smem:[#allocation41_spill]]  ;;  %s2718_s12 = sld [smem:[#allocation44_spill]] }
  0x8e   :  { %2695 = vst [vmem:[#allocation63_spill] sm:$0xff] %v1909_v12  ;;  %1117 = vtanh.f32 %v372_v31  ;;  %2696 = vst [vmem:[#allocation64_spill] sm:$0xff] %v1919_v14  ;;  %v1922_v18 = vstv %s1833_s28  ;;  %v1925_v22 = vstv %s1845_s25  ;;  %v1928_v26 = vstv %s1847_s24  ;;  %s2719_s1 = sld [smem:[#allocation46_spill]]  ;;  %s2720_s5 = sld [smem:[#allocation47_spill]] }
  0x8f   :  { %2697 = vst [vmem:[#allocation65_spill] sm:$0xff] %v1922_v18  ;;  %2698 = vst [vmem:[#allocation66_spill] sm:$0xff] %v1925_v22  ;;  %1119 = vtanh.f32 %v384_v37  ;;  %v1931_v62 = vstv %s1856_s4  ;;  %v1934_v32 = vstv %s1858_s21  ;;  %v206_v17 = vmul.f32 %v204_v39, %v1914_v30  ;;  %s2722_s14 = sld [smem:[#allocation49_spill]]  ;;  %s2727_s15 = sld [smem:[#allocation50_spill]] }
  0x90   :  { %2699 = vst [vmem:[#allocation67_spill] sm:$0xff] %v1928_v26  ;;  %2700 = vst [vmem:[#allocation68_spill] sm:$0xff] %v1931_v62  ;;  %v209_v21 = vmul.f32 %v207_v40, %v1916_v53  ;;  %v217_v31 = vmul.f32 %v215_v45, %v1914_v30  ;;  %v220_v35 = vmul.f32 %v218_v46, %v1916_v53  ;;  %v2702_v39 = vstv %s1633_s18  ;;  %s2730_s16 = sld [smem:[#allocation51_spill]]  ;;  %s2733_s17 = sld [smem:[#allocation52_spill]] }
  0x91   :  { %2701 = vst [vmem:[#allocation69_spill] sm:$0xff] %v1934_v32  ;;  %v228_v37 = vmul.f32 %v226_v49, %v1914_v30  ;;  %v231_v57 = vmul.f32 %v229_v50, %v1916_v53  ;;  %v239_v3 = vmul.f32 %v237_v54, %v1914_v30  ;;  %v242_v40 = vmul.f32 %v2702_v39, %v1916_v53  ;;  %s1426_s7 = smov [#allocation16]  }
  0x92   :  { %v1106_v59 = vpop.eup %1105  ;;  %v1961_v52 = vstv %s1878_s30  ;;  %v1964_v45 = vstv %s1880_s29  ;;  %v211_v46 = vadd.f32 %v209_v21, %v206_v17  ;;  %v222_v49 = vadd.f32 %v220_v35, %v217_v31  ;;  %s984_s18 = sshll.u32 %s1426_s7, 4  ;;  %s985_s18 = int_to_ptr.vmem [resolvable:$true] %s984_s18 }
  0x93   :  { %v1108_v48 = vpop.eup %1107  ;;  %v389_v50 = vmul.f32 %v1106_v59, %v1886_v36  ;;  %v430_v2 = vmul.f32 %v1106_v59, %v1919_v14  ;;  %v233_v0 = vadd.f32 %v231_v57, %v228_v37  ;;  %v244_v54 = vadd.f32 %v242_v40, %v239_v3  ;;  %p1342_p0 = scmp.lt.s32.totalorder %s985_s18, %s985_s18 }
  0x94   :  { %v1110_v13 = vpop.eup %1109  ;;  %v392_v39 = vmul.f32 %v1108_v48, %v1889_v4  ;;  %v433_v42 = vmul.f32 %v1108_v48, %v1922_v18  ;;  %v1971_v9 = vstv %s1897_s26  ;;  %v2704_v17 = vstv %s1648_s19  ;;  %s1337_s19 = scalar_lea.vmem %s985_s18, 512 }
  0x95   :  { %v250_v21 = vmul.f32 %v2704_v17, %v1914_v30  ;;  %v1112_v31 = vpop.eup %1111  ;;  %v397_v35 = vmul.f32 %v1110_v13, %v1892_v58  ;;  %v438_v59 = vmul.f32 %v1110_v13, %v1925_v22  ;;  %v2706_v3 = vstv %s1711_s0  ;;  %p1338_p13 = scmp.ne.s32.totalorder %s985_s18, %s1337_s19  ;;  %p1343_p1 = scmp.lt.s32.totalorder %s1337_s19, %s1337_s19 }
  0x96   :  { %v1980_v57 = vadd.f32 %v2706_v3, %v211_v46  ;;  %v2708_v37 = vstv %s1650_s20  ;;  %v1114_v14 = vpop.eup %1113  ;;  %v394_v48 = vadd.f32 %v392_v39, %v389_v50  ;;  %v402_v18 = vmul.f32 %v1112_v31, %v1895_v43 }
  0x97   :  { %v253_v40 = vmul.f32 %v2708_v37, %v1916_v53  ;;  %v435_v4 = vadd.f32 %v433_v42, %v430_v2  ;;  %v443_v36 = vmul.f32 %v1112_v31, %v1928_v26  ;;  %v1116_v17 = vpop.eup %1115  ;;  %v2710_v47 = vstv %s1713_s3  ;;  %p1344_p2 = por %p1343_p1, %p1342_p0 }
  0x98   :  { %2707 = vst [vmem:[#allocation70_spill] sm:$0xff] %v1980_v57  ;;  %v1989_v55 = vadd.f32 %v2710_v47, %v222_v49  ;;  %v2712_v58 = vstv %s1723_s22  ;;  %v2714_v46 = vstv %s2703_s8  ;;  %v2716_v37 = vstv %s2705_s9  ;;  %v1118_v50 = vpop.eup %1117 }
  0x99   :  { %v1993_v13 = vadd.f32 %v2712_v58, %v233_v0  ;;  %v1997_v3 = vadd.f32 %v2714_v46, %v244_v54  ;;  %v261_v22 = vmul.f32 %v2716_v37, %v1914_v30  ;;  %v399_v39 = vadd.f32 %v397_v35, %v394_v48  ;;  %v1120_v49 = vpop.eup %1119  ;;  %v2006_v54 = vld [vmem:[#allocation3 + $0x8] sm:$0xff]  ;;  %p1345_p3 = pnand %p1344_p2, %p1338_p13 }
  0x9a   :  { %2711 = vst [vmem:[#allocation71_spill] sm:$0xff] %v1989_v55  ;;  %v407_v2 = vmul.f32 %v1114_v14, %v1900_v41  ;;  %v440_v42 = vadd.f32 %v438_v59, %v435_v4  ;;  %v448_v47 = vmul.f32 %v1114_v14, %v1931_v62  ;;  %v412_v0 = vmul.f32 %v1116_v17, %v1903_v51  ;;  %v2013_v14 = vld [vmem:[#allocation3 + $0x18] sm:$0xff] }
  0x9b   :  { %2713 = vst [vmem:[#allocation72_spill] sm:$0xff] %v1993_v13  ;;  %2715 = vst [vmem:[#allocation73_spill] sm:$0xff] %v1997_v3  ;;  %v453_v58 = vmul.f32 %v1116_v17, %v1934_v32  ;;  %v255_v31 = vadd.f32 %v253_v40, %v250_v21  ;;  %v2721_v46 = vstv %s2709_s10  ;;  %v404_v48 = vadd.f32 %v402_v18, %v399_v39 }
  0x9c   :  { %v264_v35 = vmul.f32 %v2721_v46, %v1916_v53  ;;  %v417_v37 = vmul.f32 %v1118_v50, %v1906_v44  ;;  %v445_v4 = vadd.f32 %v443_v36, %v440_v42  ;;  %v458_v59 = vmul.f32 %v1118_v50, %v1961_v52 }
  0x9d   :  { %v2723_v51 = vstv %s2717_s11  ;;  %v2724_v17 = vstv %s2718_s12  ;;  %v2725_v21 = vstv %s2719_s1  ;;  %v409_v26 = vadd.f32 %v407_v2, %v404_v48 }
  0x9e   :  { %v266_v62 = vadd.f32 %v264_v35, %v261_v22  ;;  %v272_v41 = vmul.f32 %v2723_v51, %v1914_v30  ;;  %v275_v32 = vmul.f32 %v2724_v17, %v1916_v53  ;;  %v283_v40 = vmul.f32 %v2725_v21, %v1914_v30 }
  0x9f   :  { %v450_v46 = vadd.f32 %v448_v47, %v445_v4  ;;  %v2726_v18 = vstv %s2720_s5  ;;  %v294_v36 = vmul.f32 %v1563_v6, %v2006_v54  ;;  %v422_v22 = vmul.f32 %v1120_v49, %v1909_v12 }
  0xa0   :  { %v286_v39 = vmul.f32 %v2726_v18, %v1916_v53  ;;  %v2728_v50 = vstv %s2722_s14  ;;  %v299_v51 = vmul.f32 %v1565_v7, %v2013_v14  ;;  %v306_v30 = vmul.f32 %v1577_v10, %v2006_v54 }
  0xa1   :  { %v2032_v42 = vadd.f32 %v2728_v50, %v255_v31  ;;  %v414_v2 = vadd.f32 %v412_v0, %v409_v26  ;;  %v455_v47 = vadd.f32 %v453_v58, %v450_v46  ;;  %v463_v35 = vmul.f32 %v1120_v49, %v1964_v45 }
  0xa2   :  { %v296_v53 = vadd.f32 %v294_v36, %v1980_v57  ;;  %v277_v48 = vadd.f32 %v275_v32, %v272_v41  ;;  %v308_v4 = vadd.f32 %v306_v30, %v1989_v55  ;;  %v311_v31 = vmul.f32 %v1579_v11, %v2013_v14 }
  0xa3   :  { %2729 = vst [vmem:[#allocation74_spill] sm:$0xff] %v2032_v42  ;;  %v318_v17 = vmul.f32 %v1593_v15, %v2006_v54  ;;  %v419_v21 = vadd.f32 %v417_v37, %v414_v2  ;;  %v460_v18 = vadd.f32 %v458_v59, %v455_v47  ;;  %v2731_v50 = vstv %s2727_s15 }
  0xa4   :  { %v2047_v12 = vadd.f32 %v2731_v50, %v266_v62  ;;  %v288_v26 = vadd.f32 %v286_v39, %v283_v40  ;;  %v301_v0 = vadd.f32 %v299_v51, %v296_v53  ;;  %v323_v41 = vmul.f32 %v1595_v16, %v2013_v14 }
  0xa5   :  { %v320_v49 = vadd.f32 %v318_v17, %v1993_v13  ;;  %v330_v32 = vmul.f32 %v1609_v19, %v2006_v54  ;;  %v424_v58 = vadd.f32 %v422_v22, %v419_v21  ;;  %v465_v46 = vadd.f32 %v463_v35, %v460_v18  ;;  %v2742_v13 = vld [vmem:[#allocation55_spill] sm:$0xff] }
  0xa6   :  { %2732 = vst [vmem:[#allocation75_spill] sm:$0xff] %v2047_v12  ;;  %v313_v36 = vadd.f32 %v311_v31, %v308_v4  ;;  %v335_v37 = vmul.f32 %v1612_v20, %v2013_v14  ;;  %v2734_v59 = vstv %s2730_s16  ;;  %v342_v51 = vmul.f32 %v1626_v23, %v2006_v54 }
  0xa7   :  { %v2058_v62 = vadd.f32 %v2734_v59, %v277_v48  ;;  %v325_v40 = vadd.f32 %v323_v41, %v320_v49  ;;  %v332_v39 = vadd.f32 %v330_v32, %v1997_v3  ;;  %v427_v30 = vadd.f32 %v1912_v29, %v424_v58 }
  0xa8   :  { %v468_v2 = vadd.f32 %v1971_v9, %v465_v46  ;;  %v347_v22 = vmul.f32 %v1629_v24, %v2013_v14  ;;  %v354_v47 = vmul.f32 %v1643_v27, %v2006_v54  ;;  %v2736_v35 = vstv %s2733_s17 }
  0xa9   :  { %2735 = vst [vmem:[#allocation76_spill] sm:$0xff] %v2058_v62  ;;  %v2071_v53 = vadd.f32 %v2736_v35, %v288_v26  ;;  %1121 = vtanh.f32 %v301_v0  ;;  %v337_v48 = vadd.f32 %v335_v37, %v332_v39  ;;  %v344_v4 = vadd.f32 %v342_v51, %v2032_v42 }
  0xaa   :  { %v2738_v31 = vsub.f32 1.0, %v1539_v1  ;;  %v2739_v21 = vsub.f32 1.0, %v1561_v5  ;;  %1123 = vtanh.f32 %v313_v36  ;;  %v366_v50 = vmul.f32 %v1664_v33, %v2006_v54 }
  0xab   :  { %2737 = vst [vmem:[#allocation77_spill] sm:$0xff] %v2071_v53  ;;  %1125 = vtanh.f32 %v325_v40  ;;  %v349_v49 = vadd.f32 %v347_v22, %v344_v4  ;;  %v359_v26 = vmul.f32 %v1646_v28, %v2013_v14  ;;  %v378_v0 = vmul.f32 %v1685_v38, %v2006_v54 }
  0xac   :  { %v474_v17 = vmul.f32 %v2738_v31, %v427_v30  ;;  %v482_v18 = vmul.f32 %v2739_v21, %v468_v2  ;;  %1127 = vtanh.f32 %v337_v48  ;;  %v356_v58 = vadd.f32 %v354_v47, %v2047_v12  ;;  %v2741_v12 = vld [vmem:[#allocation54_spill] sm:$0xff] }
  0xad   :  { %1129 = vtanh.f32 %v349_v49  ;;  %v368_v46 = vadd.f32 %v366_v50, %v2058_v62  ;;  %v371_v36 = vmul.f32 %v1667_v34, %v2013_v14  ;;  %v380_v37 = vadd.f32 %v378_v0, %v2071_v53 }
  0xae   :  { %v2085_v41 = vadd.f32 %v474_v17, %v1568_v8  ;;  %v2088_v32 = vadd.f32 %v482_v18, %v1875_v25 }
  0xb0   :  { %v486_v59 = vmul.f32 %v2085_v41, %v1563_v6  ;;  %v490_v40 = vmul.f32 %v2088_v32, %v1565_v7  ;;  %v496_v39 = vmul.f32 %v2085_v41, %v1577_v10  ;;  %v500_v51 = vmul.f32 %v2088_v32, %v1579_v11 }
  0xb1   :  { %v506_v30 = vmul.f32 %v2085_v41, %v1593_v15  ;;  %v510_v2 = vmul.f32 %v2088_v32, %v1595_v16  ;;  %v516_v22 = vmul.f32 %v2085_v41, %v1609_v19  ;;  %v520_v47 = vmul.f32 %v2088_v32, %v1612_v20 }
  0xb2   :  { %v488_v35 = vadd.f32 %v486_v59, %v1776_v56  ;;  %v498_v48 = vadd.f32 %v496_v39, %v1780_v60  ;;  %v526_v4 = vmul.f32 %v2085_v41, %v1626_v23  ;;  %v530_v31 = vmul.f32 %v2088_v32, %v1629_v24  ;;  %v2740_v59 = vld [vmem:[#allocation53_spill] sm:$0xff] }
  0xb3   :  { %v508_v17 = vadd.f32 %v506_v30, %v1790_v61  ;;  %v518_v21 = vadd.f32 %v516_v22, %v1794_v63  ;;  %v536_v18 = vmul.f32 %v2085_v41, %v1643_v27  ;;  %v540_v50 = vmul.f32 %v2088_v32, %v1646_v28  ;;  %v1122_v8 = vpop.eup %1121 }
  0xb4   :  { %v492_v49 = vadd.f32 %v490_v40, %v488_v35  ;;  %v502_v0 = vadd.f32 %v500_v51, %v498_v48  ;;  %v528_v39 = vadd.f32 %v526_v4, %v2740_v59  ;;  %v546_v25 = vmul.f32 %v2085_v41, %v1664_v33  ;;  %v1124_v42 = vpop.eup %1123  ;;  %v2743_v48 = vld [vmem:[#allocation45_spill] sm:$0xff] }
  0xb5   :  { %v512_v53 = vadd.f32 %v510_v2, %v508_v17  ;;  %v522_v62 = vadd.f32 %v520_v47, %v518_v21  ;;  %v538_v30 = vadd.f32 %v536_v18, %v2741_v12  ;;  %v550_v22 = vmul.f32 %v2088_v32, %v1667_v34  ;;  %v1126_v51 = vpop.eup %1125  ;;  %v2744_v21 = vld [vmem:[#allocation56_spill] sm:$0xff] }
  0xb6   :  { %1131 = vtanh.f32 %v492_v49  ;;  %v532_v3 = vadd.f32 %v530_v31, %v528_v39  ;;  %v548_v55 = vadd.f32 %v546_v25, %v2742_v13  ;;  %v556_v40 = vmul.f32 %v2085_v41, %v1685_v38  ;;  %v1128_v4 = vpop.eup %1127  ;;  %v2745_v49 = vld [vmem:[#allocation58_spill] sm:$0xff]  ;;  %v2747_v13 = vld [vmem:[#allocation60_spill] sm:$0xff] }
  0xb7   :  { %1133 = vtanh.f32 %v502_v0  ;;  %v542_v35 = vadd.f32 %v540_v50, %v538_v30  ;;  %v560_v2 = vmul.f32 %v2088_v32, %v2743_v48  ;;  %v383_v47 = vmul.f32 %v2743_v48, %v2013_v14  ;;  %v1130_v31 = vpop.eup %1129  ;;  %v2746_v50 = vld [vmem:[#allocation59_spill] sm:$0xff]  ;;  %v2748_v48 = vld [vmem:[#allocation64_spill] sm:$0xff] }
  0xb8   :  { %1135 = vtanh.f32 %v512_v53  ;;  %v552_v17 = vadd.f32 %v550_v22, %v548_v55  ;;  %v558_v18 = vadd.f32 %v556_v40, %v2744_v21  ;;  %v361_v25 = vadd.f32 %v359_v26, %v356_v58  ;;  %v2749_v53 = vld [vmem:[#allocation65_spill] sm:$0xff]  ;;  %v2750_v40 = vld [vmem:[#allocation66_spill] sm:$0xff] }
  0xb9   :  { %1137 = vtanh.f32 %v522_v62  ;;  %v390_v39 = vmul.f32 %v1122_v8, %v2745_v49  ;;  %v373_v0 = vadd.f32 %v371_v36, %v368_v46  ;;  %v393_v30 = vmul.f32 %v1124_v42, %v2746_v50  ;;  %v2751_v46 = vld [vmem:[#allocation67_spill] sm:$0xff] }
  0xba   :  { %1139 = vtanh.f32 %v532_v3  ;;  %v562_v57 = vadd.f32 %v560_v2, %v558_v18  ;;  %v385_v38 = vadd.f32 %v383_v47, %v380_v37  ;;  %v398_v34 = vmul.f32 %v1126_v51, %v2747_v13 }
  0xbb   :  { %1141 = vtanh.f32 %v542_v35  ;;  %v431_v12 = vmul.f32 %v1122_v8, %v2748_v48  ;;  %v395_v55 = vadd.f32 %v393_v30, %v390_v39  ;;  %v434_v22 = vmul.f32 %v1124_v42, %v2749_v53 }
  0xbc   :  { %1143 = vtanh.f32 %v552_v17  ;;  %v439_v62 = vmul.f32 %v1126_v51, %v2750_v40  ;;  %v403_v58 = vmul.f32 %v1128_v4, %v1895_v43  ;;  %v444_v36 = vmul.f32 %v1128_v4, %v2751_v46 }
  0xbd   :  { %1145 = vtanh.f32 %v562_v57  ;;  %v436_v26 = vadd.f32 %v434_v22, %v431_v12  ;;  %v400_v3 = vadd.f32 %v398_v34, %v395_v55  ;;  %v2752_v12 = vld [vmem:[#allocation61_spill] sm:$0xff]  ;;  %v2753_v34 = vld [vmem:[#allocation68_spill] sm:$0xff] }
  0xbe   :  { %1147 = vtanh.f32 %v361_v25  ;;  %v408_v17 = vmul.f32 %v1130_v31, %v2752_v12  ;;  %v449_v18 = vmul.f32 %v1130_v31, %v2753_v34 }
  0xbf   :  { %1149 = vtanh.f32 %v373_v0  ;;  %v441_v35 = vadd.f32 %v439_v62, %v436_v26  ;;  %v405_v39 = vadd.f32 %v403_v58, %v400_v3  ;;  %v2756_v3 = vld [vmem:[#allocation29_spill] sm:$0xff] }
  0xc0   :  { %v1132_v37 = vpop.eup %1131  ;;  %1151 = vtanh.f32 %v385_v38  ;;  %v2161_v58 = vunpack.c.h.bf16 %v2756_v3 }
  0xc1   :  { %v1134_v2 = vpop.eup %1133  ;;  %v566_v8 = vmul.f32 %v1132_v37, %v2745_v49  ;;  %v598_v47 = vmul.f32 %v1132_v37, %v2748_v48  ;;  %v446_v0 = vadd.f32 %v444_v36, %v441_v35  ;;  %v2754_v49 = vld [vmem:[#allocation27_spill] sm:$0xff]  ;;  %v410_v36 = vadd.f32 %v408_v17, %v405_v39 }
  0xc2   :  { %v1136_v42 = vpop.eup %1135  ;;  %v568_v51 = vmul.f32 %v1134_v2, %v2746_v50  ;;  %v600_v57 = vmul.f32 %v1134_v2, %v2749_v53  ;;  %2757 = vst [vmem:[#allocation27_spill] sm:$0xff] %v2161_v58 }
  0xc3   :  { %v1138_v25 = vpop.eup %1137  ;;  %v572_v4 = vmul.f32 %v1136_v42, %v2747_v13  ;;  %v604_v38 = vmul.f32 %v1136_v42, %v2750_v40  ;;  %v2158_v42 = vunpack.c.h.bf16 %v2754_v49  ;;  %v451_v35 = vadd.f32 %v449_v18, %v446_v0  ;;  %v2760_v0 = vld [vmem:[#allocation63_spill] sm:$0xff] }
  0xc4   :  { %v1140_v30 = vpop.eup %1139  ;;  %v570_v55 = vadd.f32 %v568_v51, %v566_v8  ;;  %v576_v22 = vmul.f32 %v1138_v25, %v1895_v43  ;;  %v602_v62 = vadd.f32 %v600_v57, %v598_v47  ;;  %v608_v26 = vmul.f32 %v1138_v25, %v2751_v46  ;;  %v2758_v51 = vld [vmem:[#allocation62_spill] sm:$0xff] }
  0xc5   :  { %v1142_v37 = vpop.eup %1141  ;;  %v580_v50 = vmul.f32 %v1140_v30, %v2752_v12  ;;  %v612_v48 = vmul.f32 %v1140_v30, %v2753_v34  ;;  %2755 = vst [vmem:[#allocation53_spill] sm:$0xff] %v2158_v42 }
  0xc6   :  { %v1144_v2 = vpop.eup %1143  ;;  %v574_v53 = vadd.f32 %v572_v4, %v570_v55  ;;  %v606_v31 = vadd.f32 %v604_v38, %v602_v62  ;;  %v584_v57 = vmul.f32 %v1142_v37, %v2758_v51  ;;  %v2759_v4 = vld [vmem:[#allocation69_spill] sm:$0xff] }
  0xc7   :  { %v1146_v13 = vpop.eup %1145  ;;  %v616_v55 = vmul.f32 %v1142_v37, %v2759_v4  ;;  %v588_v38 = vmul.f32 %v1144_v2, %v1906_v44  ;;  %v620_v30 = vmul.f32 %v1144_v2, %v1961_v52 }
  0xc8   :  { %v1148_v8 = vpop.eup %1147  ;;  %v578_v47 = vadd.f32 %v576_v22, %v574_v53  ;;  %v610_v25 = vadd.f32 %v608_v26, %v606_v31  ;;  %v592_v2 = vmul.f32 %v1146_v13, %v2760_v0 }
  0xc9   :  { %v1150_v12 = vpop.eup %1149  ;;  %v413_v49 = vmul.f32 %v1148_v8, %v2758_v51  ;;  %v454_v62 = vmul.f32 %v1148_v8, %v2759_v4  ;;  %v624_v51 = vmul.f32 %v1146_v13, %v1964_v45  ;;  %v2185_v13 = vmul.f32 %v2161_v58, %v2013_v14 }
  0xca   :  { %v1152_v3 = vpop.eup %1151  ;;  %v582_v34 = vadd.f32 %v580_v50, %v578_v47  ;;  %v614_v17 = vadd.f32 %v612_v48, %v610_v25  ;;  %v418_v18 = vmul.f32 %v1150_v12, %v1906_v44  ;;  %v459_v53 = vmul.f32 %v1150_v12, %v1961_v52 }
  0xcb   :  { %v415_v39 = vadd.f32 %v413_v49, %v410_v36  ;;  %v423_v22 = vmul.f32 %v1152_v3, %v2760_v0  ;;  %v456_v26 = vadd.f32 %v454_v62, %v451_v35  ;;  %v464_v37 = vmul.f32 %v1152_v3, %v1964_v45  ;;  %2762 = vst [vmem:[#allocation63_spill] sm:$0xff] %v2185_v13 }
  0xcc   :  { %v586_v31 = vadd.f32 %v584_v57, %v582_v34  ;;  %v618_v46 = vadd.f32 %v616_v55, %v614_v17  ;;  %v2629_v12 = vsub.f32 1.0, %v2158_v42  ;;  %v2628_v36 = vsub.f32 1.0, %v2161_v58 }
  0xcd   :  { %v420_v8 = vadd.f32 %v418_v18, %v415_v39  ;;  %v461_v4 = vadd.f32 %v459_v53, %v456_v26  ;;  %v2181_v57 = vmul.f32 %v2158_v42, %v2006_v54  ;;  %v630_v55 = vmul.f32 %v1539_v1, %v2085_v41  ;;  %v2787_v42 = vld [vmem:[#allocation68_spill] sm:$0xff] }
  0xce   :  { %v590_v50 = vadd.f32 %v588_v38, %v586_v31  ;;  %v622_v48 = vadd.f32 %v620_v30, %v618_v46  ;;  %v2763_v30 = vsub.f32 1.0, %v1539_v1  ;;  %v2764_v3 = vsub.f32 1.0, %v1561_v5 }
  0xcf   :  { %v425_v47 = vadd.f32 %v423_v22, %v420_v8  ;;  %v466_v25 = vadd.f32 %v464_v37, %v461_v4  ;;  %2761 = vst [vmem:[#allocation29_spill] sm:$0xff] %v2181_v57 }
  0xd0   :  { %v594_v49 = vadd.f32 %v592_v2, %v590_v50  ;;  %v626_v35 = vadd.f32 %v624_v51, %v622_v48  ;;  %v636_v51 = vmul.f32 %v1561_v5, %v2088_v32  ;;  %v2770_v5 = vld [vmem:[#allocation42_spill] sm:$0xff] }
  0xd1   :  { %v428_v62 = vadd.f32 %v1912_v29, %v425_v47  ;;  %v469_v34 = vadd.f32 %v1971_v9, %v466_v25 }
  0xd2   :  { %v596_v46 = vadd.f32 %v594_v49, %v1912_v29  ;;  %v628_v4 = vadd.f32 %v626_v35, %v1971_v9 }
  0xd3   :  { %v475_v38 = vmul.f32 %v2629_v12, %v428_v62  ;;  %v483_v54 = vmul.f32 %v2628_v36, %v469_v34  ;;  %v2768_v12 = vld [vmem:[#allocation39_spill] sm:$0xff] }
  0xd4   :  { %v632_v14 = vmul.f32 %v596_v46, %v2763_v30  ;;  %v638_v17 = vmul.f32 %v628_v4, %v2764_v3 }
  0xd5   :  { %v2202_v18 = vadd.f32 %v475_v38, %v2181_v57  ;;  %v2205_v41 = vadd.f32 %v483_v54, %v2185_v13  ;;  %v2769_v57 = vld [vmem:[#allocation55_spill] sm:$0xff] }
  0xd6   :  { %v634_v53 = vadd.f32 %v632_v14, %v630_v55  ;;  %v640_v32 = vadd.f32 %v638_v17, %v636_v51 }
  0xd7   :  { %2765 = vst [vmem:[#allocation78_spill] sm:$0xff] %v2202_v18  ;;  %2766 = vst [vmem:[#allocation79_spill] sm:$0xff] %v2205_v41  ;;  %v487_v39 = vmul.f32 %v2202_v18, %v1563_v6  ;;  %v491_v22 = vmul.f32 %v2205_v41, %v1565_v7  ;;  %v497_v26 = vmul.f32 %v2202_v18, %v1577_v10 }
  0xd8   :  { %v501_v37 = vmul.f32 %v2205_v41, %v1579_v11  ;;  %v642_v31 = vmul.f32 %v634_v53, %v1563_v6  ;;  %v646_v2 = vmul.f32 %v640_v32, %v1565_v7  ;;  %v652_v8 = vmul.f32 %v634_v53, %v1577_v10 }
  0xd9   :  { %v656_v50 = vmul.f32 %v640_v32, %v1579_v11  ;;  %v662_v48 = vmul.f32 %v634_v53, %v1593_v15  ;;  %v666_v47 = vmul.f32 %v640_v32, %v1595_v16  ;;  %v672_v25 = vmul.f32 %v634_v53, %v1609_v19 }
  0xda   :  { %v676_v49 = vmul.f32 %v640_v32, %v1612_v20  ;;  %v644_v35 = vadd.f32 %v642_v31, %v1776_v56  ;;  %v654_v62 = vadd.f32 %v652_v8, %v1780_v60  ;;  %v682_v34 = vmul.f32 %v634_v53, %v1626_v23  ;;  %v2767_v8 = vld [vmem:[#allocation54_spill] sm:$0xff] }
  0xdb   :  { %v686_v46 = vmul.f32 %v640_v32, %v1629_v24  ;;  %v664_v4 = vadd.f32 %v662_v48, %v1790_v61  ;;  %v674_v55 = vadd.f32 %v672_v25, %v1794_v63  ;;  %v692_v51 = vmul.f32 %v634_v53, %v1643_v27 }
  0xdc   :  { %v696_v38 = vmul.f32 %v640_v32, %v1646_v28  ;;  %v648_v54 = vadd.f32 %v646_v2, %v644_v35  ;;  %v658_v30 = vadd.f32 %v656_v50, %v654_v62  ;;  %v684_v14 = vadd.f32 %v682_v34, %v2740_v59  ;;  %v2771_v2 = vld [vmem:[#allocation45_spill] sm:$0xff]  ;;  %v2772_v35 = vld [vmem:[#allocation70_spill] sm:$0xff] }
  0xdd   :  { %v702_v3 = vmul.f32 %v634_v53, %v1664_v33  ;;  %v668_v17 = vadd.f32 %v666_v47, %v664_v4  ;;  %v678_v31 = vadd.f32 %v676_v49, %v674_v55  ;;  %v694_v36 = vadd.f32 %v692_v51, %v2767_v8  ;;  %v2773_v49 = vld [vmem:[#allocation71_spill] sm:$0xff] }
  0xde   :  { %v706_v13 = vmul.f32 %v640_v32, %v2768_v12  ;;  %1153 = vtanh.f32 %v648_v54  ;;  %v688_v48 = vadd.f32 %v686_v46, %v684_v14  ;;  %v712_v1 = vmul.f32 %v634_v53, %v2770_v5 }
  0xdf   :  { %v704_v25 = vadd.f32 %v702_v3, %v2769_v57  ;;  %1155 = vtanh.f32 %v658_v30  ;;  %v698_v58 = vadd.f32 %v696_v38, %v694_v36  ;;  %v716_v50 = vmul.f32 %v640_v32, %v2771_v2 }
  0xe0   :  { %v489_v62 = vadd.f32 %v487_v39, %v2772_v35  ;;  %1157 = vtanh.f32 %v668_v17  ;;  %v714_v47 = vadd.f32 %v712_v1, %v2744_v21  ;;  %v499_v4 = vadd.f32 %v497_v26, %v2773_v49  ;;  %v2775_v26 = vld [vmem:[#allocation73_spill] sm:$0xff] }
  0xe1   :  { %v708_v34 = vadd.f32 %v706_v13, %v704_v25  ;;  %1159 = vtanh.f32 %v678_v31  ;;  %v507_v46 = vmul.f32 %v2202_v18, %v1593_v15  ;;  %v511_v53 = vmul.f32 %v2205_v41, %v1595_v16  ;;  %v2774_v13 = vld [vmem:[#allocation72_spill] sm:$0xff]  ;;  %v2777_v31 = vld [vmem:[#allocation75_spill] sm:$0xff] }
  0xe2   :  { %v493_v55 = vadd.f32 %v491_v22, %v489_v62  ;;  %1161 = vtanh.f32 %v688_v48  ;;  %v718_v36 = vadd.f32 %v716_v50, %v714_v47  ;;  %v503_v51 = vadd.f32 %v501_v37, %v499_v4 }
  0xe3   :  { %v517_v32 = vmul.f32 %v2202_v18, %v1609_v19  ;;  %1163 = vtanh.f32 %v698_v58  ;;  %v509_v39 = vadd.f32 %v507_v46, %v2774_v13  ;;  %v521_v1 = vmul.f32 %v2205_v41, %v1612_v20  ;;  %v2776_v58 = vld [vmem:[#allocation74_spill] sm:$0xff]  ;;  %v2778_v46 = vld [vmem:[#allocation76_spill] sm:$0xff] }
  0xe4   :  { %v527_v22 = vmul.f32 %v2202_v18, %v1626_v23  ;;  %1165 = vtanh.f32 %v708_v34  ;;  %v531_v54 = vmul.f32 %v2205_v41, %v1629_v24  ;;  %v537_v37 = vmul.f32 %v2202_v18, %v1643_v27 }
  0xe5   :  { %v519_v38 = vadd.f32 %v517_v32, %v2775_v26  ;;  %1167 = vtanh.f32 %v718_v36  ;;  %v513_v30 = vadd.f32 %v511_v53, %v509_v39  ;;  %v541_v3 = vmul.f32 %v2205_v41, %v1646_v28  ;;  %v2779_v32 = vld [vmem:[#allocation58_spill] sm:$0xff] }
  0xe6   :  { %v529_v14 = vadd.f32 %v527_v22, %v2776_v58  ;;  %1169 = vtanh.f32 %v493_v55  ;;  %v539_v48 = vadd.f32 %v537_v37, %v2777_v31  ;;  %v547_v25 = vmul.f32 %v2202_v18, %v1664_v33  ;;  %v2781_v22 = vld [vmem:[#allocation77_spill] sm:$0xff]  ;;  %v2782_v37 = vld [vmem:[#allocation59_spill] sm:$0xff] }
  0xe7   :  { %v523_v17 = vadd.f32 %v521_v1, %v519_v38  ;;  %1171 = vtanh.f32 %v503_v51  ;;  %v551_v62 = vmul.f32 %v2205_v41, %v2768_v12  ;;  %v557_v34 = vmul.f32 %v2202_v18, %v2770_v5  ;;  %v2780_v1 = vld [vmem:[#allocation64_spill] sm:$0xff]  ;;  %v2783_v31 = vld [vmem:[#allocation65_spill] sm:$0xff] }
  0xe8   :  { %v533_v50 = vadd.f32 %v531_v54, %v529_v14  ;;  %v1154_v47 = vpop.eup %1153  ;;  %1173 = vtanh.f32 %v513_v30  ;;  %v543_v4 = vadd.f32 %v541_v3, %v539_v48  ;;  %v549_v53 = vadd.f32 %v547_v25, %v2778_v46  ;;  %v2784_v48 = vld [vmem:[#allocation60_spill] sm:$0xff] }
  0xe9   :  { %v561_v55 = vmul.f32 %v2205_v41, %v2771_v2  ;;  %v1156_v36 = vpop.eup %1155  ;;  %v722_v39 = vmul.f32 %v1154_v47, %v2779_v32  ;;  %v754_v51 = vmul.f32 %v1154_v47, %v2780_v1  ;;  %1175 = vtanh.f32 %v523_v17 }
  0xea   :  { %v559_v38 = vadd.f32 %v557_v34, %v2781_v22  ;;  %v1158_v54 = vpop.eup %1157  ;;  %v724_v14 = vmul.f32 %v1156_v36, %v2782_v37  ;;  %v756_v58 = vmul.f32 %v1156_v36, %v2783_v31  ;;  %1177 = vtanh.f32 %v533_v50  ;;  %v2785_v34 = vld [vmem:[#allocation67_spill] sm:$0xff]  ;;  %v2786_v50 = vld [vmem:[#allocation61_spill] sm:$0xff] }
  0xeb   :  { %v553_v30 = vadd.f32 %v551_v62, %v549_v53  ;;  %v1160_v3 = vpop.eup %1159  ;;  %v728_v25 = vmul.f32 %v1158_v54, %v2784_v48  ;;  %v760_v46 = vmul.f32 %v1158_v54, %v2750_v40  ;;  %1179 = vtanh.f32 %v543_v4 }
  0xec   :  { %v563_v26 = vadd.f32 %v561_v55, %v559_v38  ;;  %v1162_v13 = vpop.eup %1161  ;;  %v726_v49 = vadd.f32 %v724_v14, %v722_v39  ;;  %v732_v17 = vmul.f32 %v1160_v3, %v1895_v43  ;;  %v758_v47 = vadd.f32 %v756_v58, %v754_v51  ;;  %v2788_v38 = vld [vmem:[#allocation62_spill] sm:$0xff]  ;;  %v2789_v14 = vld [vmem:[#allocation69_spill] sm:$0xff] }
  0xed   :  { %v764_v22 = vmul.f32 %v1160_v3, %v2785_v34  ;;  %v1164_v35 = vpop.eup %1163  ;;  %1181 = vtanh.f32 %v553_v30  ;;  %v736_v62 = vmul.f32 %v1162_v13, %v2786_v50  ;;  %v768_v18 = vmul.f32 %v1162_v13, %v2787_v42 }
  0xee   :  { %v1166_v41 = vpop.eup %1165  ;;  %v730_v36 = vadd.f32 %v728_v25, %v726_v49  ;;  %v762_v53 = vadd.f32 %v760_v46, %v758_v47  ;;  %1183 = vtanh.f32 %v563_v26  ;;  %v740_v39 = vmul.f32 %v1164_v35, %v2788_v38 }
  0xef   :  { %v1168_v21 = vpop.eup %1167  ;;  %v772_v58 = vmul.f32 %v1164_v35, %v2789_v14  ;;  %v744_v3 = vmul.f32 %v1166_v41, %v1906_v44  ;;  %v776_v30 = vmul.f32 %v1166_v41, %v1961_v52 }
  0xf0   :  { %v1170_v4 = vpop.eup %1169  ;;  %v734_v55 = vadd.f32 %v732_v17, %v730_v36  ;;  %v766_v54 = vadd.f32 %v764_v22, %v762_v53  ;;  %v748_v22 = vmul.f32 %v1168_v21, %v2760_v0  ;;  %v780_v35 = vmul.f32 %v1168_v21, %v1964_v45 }
  0xf1   :  { %v1172_v51 = vpop.eup %1171  ;;  %v567_v49 = vmul.f32 %v1170_v4, %v2779_v32  ;;  %v599_v46 = vmul.f32 %v1170_v4, %v2780_v1 }
  0xf2   :  { %v1174_v25 = vpop.eup %1173  ;;  %v738_v13 = vadd.f32 %v736_v62, %v734_v55  ;;  %v770_v47 = vadd.f32 %v768_v18, %v766_v54  ;;  %v569_v26 = vmul.f32 %v1172_v51, %v2782_v37  ;;  %v601_v17 = vmul.f32 %v1172_v51, %v2783_v31 }
  0xf3   :  { %v1176_v36 = vpop.eup %1175  ;;  %v573_v53 = vmul.f32 %v1174_v25, %v2784_v48  ;;  %v605_v41 = vmul.f32 %v1174_v25, %v2750_v40 }
  0xf4   :  { %v1178_v2 = vpop.eup %1177  ;;  %v742_v32 = vadd.f32 %v740_v39, %v738_v13  ;;  %v774_v5 = vadd.f32 %v772_v58, %v770_v47  ;;  %v571_v4 = vadd.f32 %v569_v26, %v567_v49  ;;  %v577_v62 = vmul.f32 %v1176_v36, %v1895_v43 }
  0xf5   :  { %v1180_v18 = vpop.eup %1179  ;;  %v603_v55 = vadd.f32 %v601_v17, %v599_v46  ;;  %v609_v54 = vmul.f32 %v1176_v36, %v2785_v34  ;;  %v581_v21 = vmul.f32 %v1178_v2, %v2786_v50  ;;  %v613_v48 = vmul.f32 %v1178_v2, %v2787_v42 }
  0xf6   :  { %v746_v51 = vadd.f32 %v744_v3, %v742_v32  ;;  %v778_v31 = vadd.f32 %v776_v30, %v774_v5  ;;  %v575_v1 = vadd.f32 %v573_v53, %v571_v4  ;;  %v585_v49 = vmul.f32 %v1180_v18, %v2788_v38 }
  0xf7   :  { %v1182_v37 = vpop.eup %1181  ;;  %v607_v57 = vadd.f32 %v605_v41, %v603_v55  ;;  %v617_v46 = vmul.f32 %v1180_v18, %v2789_v14 }
  0xf8   :  { %v750_v25 = vadd.f32 %v748_v22, %v746_v51  ;;  %v782_v40 = vadd.f32 %v780_v35, %v778_v31  ;;  %v579_v39 = vadd.f32 %v577_v62, %v575_v1  ;;  %v1184_v58 = vpop.eup %1183  ;;  %v589_v32 = vmul.f32 %v1182_v37, %v1906_v44 }
  0xf9   :  { %v611_v13 = vadd.f32 %v609_v54, %v607_v57  ;;  %v621_v3 = vmul.f32 %v1182_v37, %v1961_v52  ;;  %v593_v31 = vmul.f32 %v1184_v58, %v2760_v0  ;;  %v625_v30 = vmul.f32 %v1184_v58, %v1964_v45 }
  0xfa   :  { %v2300_v47 = vadd.f32 %v750_v25, %v1912_v29  ;;  %v2303_v5 = vadd.f32 %v782_v40, %v1971_v9  ;;  %v583_v2 = vadd.f32 %v581_v21, %v579_v39 }
  0xfb   :  { %v615_v1 = vadd.f32 %v613_v48, %v611_v13  ;;  %v2790_v13 = vld [vmem:[#allocation55_spill] sm:$0xff] }
  0xfc   :  { %v786_v57 = vmul.f32 %v2300_v47, %v1563_v6  ;;  %v790_v26 = vmul.f32 %v2303_v5, %v1565_v7  ;;  %v796_v40 = vmul.f32 %v2300_v47, %v1577_v10  ;;  %v800_v17 = vmul.f32 %v2303_v5, %v1579_v11  ;;  %938 = vst [vmem:[#allocation16] sm:$0xff] %v2300_v47 }
  0xfd   :  { %953 = vst [vmem:[#allocation16 + $0x10] sm:$0xff] %v2303_v5  ;;  %v806_v37 = vmul.f32 %v2300_v47, %v1593_v15  ;;  %v810_v48 = vmul.f32 %v2303_v5, %v1595_v16  ;;  %v816_v36 = vmul.f32 %v2300_v47, %v1609_v19  ;;  %v820_v22 = vmul.f32 %v2303_v5, %v1612_v20 }
  0xfe   :  { %v788_v35 = vadd.f32 %v786_v57, %v1776_v56  ;;  %v798_v53 = vadd.f32 %v796_v40, %v1780_v60  ;;  %v826_v41 = vmul.f32 %v2300_v47, %v1626_v23  ;;  %v830_v4 = vmul.f32 %v2303_v5, %v1629_v24  ;;  %v2791_v40 = vld [vmem:[#allocation42_spill] sm:$0xff] }
  0xff   :  { %v808_v62 = vadd.f32 %v806_v37, %v1790_v61  ;;  %v818_v18 = vadd.f32 %v816_v36, %v1794_v63  ;;  %v836_v55 = vmul.f32 %v2300_v47, %v1643_v27  ;;  %v840_v54 = vmul.f32 %v2303_v5, %v1646_v28 }
 0x100   :  { %v792_v51 = vadd.f32 %v790_v26, %v788_v35  ;;  %v802_v56 = vadd.f32 %v800_v17, %v798_v53  ;;  %v828_v60 = vadd.f32 %v826_v41, %v2740_v59  ;;  %v846_v21 = vmul.f32 %v2300_v47, %v1664_v33  ;;  %v2792_v59 = vld [vmem:[#allocation45_spill] sm:$0xff] }
 0x101   :  { %v812_v25 = vadd.f32 %v810_v48, %v808_v62  ;;  %v822_v39 = vadd.f32 %v820_v22, %v818_v18  ;;  %v838_v58 = vadd.f32 %v836_v55, %v2767_v8  ;;  %v850_v61 = vmul.f32 %v2303_v5, %v2768_v12  ;;  %v2793_v22 = vld [vmem:[#allocation56_spill] sm:$0xff] }
 0x102   :  { %1185 = vtanh.f32 %v792_v51  ;;  %v832_v63 = vadd.f32 %v830_v4, %v828_v60  ;;  %v848_v57 = vadd.f32 %v846_v21, %v2790_v13  ;;  %v856_v26 = vmul.f32 %v2300_v47, %v2791_v40  ;;  %v2795_v51 = vld [vmem:[#allocation53_spill] sm:$0xff]  ;;  %v2797_v60 = vld [vmem:[#allocation27_spill] sm:$0xff] }
 0x103   :  { %1187 = vtanh.f32 %v802_v56  ;;  %v842_v17 = vadd.f32 %v840_v54, %v838_v58  ;;  %v860_v37 = vmul.f32 %v2303_v5, %v2792_v59  ;;  %v587_v36 = vadd.f32 %v585_v49, %v583_v2  ;;  %v2794_v54 = vld [vmem:[#allocation78_spill] sm:$0xff]  ;;  %v2796_v56 = vld [vmem:[#allocation79_spill] sm:$0xff] }
 0x104   :  { %1189 = vtanh.f32 %v812_v25  ;;  %v852_v48 = vadd.f32 %v850_v61, %v848_v57  ;;  %v858_v8 = vadd.f32 %v856_v26, %v2793_v22  ;;  %v619_v35 = vadd.f32 %v617_v46, %v615_v1  ;;  %v2802_v26 = vld [vmem:[#allocation64_spill] sm:$0xff] }
 0x105   :  { %1191 = vtanh.f32 %v822_v39  ;;  %v591_v53 = vadd.f32 %v589_v32, %v587_v36  ;;  %v631_v49 = vmul.f32 %v2795_v51, %v2794_v54  ;;  %v637_v46 = vmul.f32 %v2797_v60, %v2796_v56  ;;  %v2804_v22 = vld [vmem:[#allocation60_spill] sm:$0xff] }
 0x106   :  { %1193 = vtanh.f32 %v832_v63  ;;  %v862_v41 = vadd.f32 %v860_v37, %v858_v8  ;;  %v623_v4 = vadd.f32 %v621_v3, %v619_v35  ;;  %v2798_v32 = vsub.f32 1.0, %v2795_v51  ;;  %v2801_v63 = vld [vmem:[#allocation59_spill] sm:$0xff]  ;;  %v2803_v37 = vld [vmem:[#allocation65_spill] sm:$0xff] }
 0x107   :  { %1195 = vtanh.f32 %v842_v17  ;;  %v595_v62 = vadd.f32 %v593_v31, %v591_v53  ;;  %v2799_v3 = vsub.f32 1.0, %v2797_v60  ;;  %v2806_v60 = vld [vmem:[#allocation71_spill] sm:$0xff] }
 0x108   :  { %1197 = vtanh.f32 %v852_v48  ;;  %v627_v18 = vadd.f32 %v625_v30, %v623_v4  ;;  %v2800_v30 = vld [vmem:[#allocation58_spill] sm:$0xff] }
 0x109   :  { %1199 = vtanh.f32 %v862_v41  ;;  %v597_v55 = vadd.f32 %v595_v62, %v1912_v29 }
 0x10a   :  { %v629_v2 = vadd.f32 %v627_v18, %v1971_v9 }
 0x10b   :  { %v633_v1 = vmul.f32 %v597_v55, %v2798_v32  ;;  %v2807_v32 = vld [vmem:[#allocation72_spill] sm:$0xff] }
 0x10c   :  { %v1186_v21 = vpop.eup %1185  ;;  %v639_v31 = vmul.f32 %v629_v2, %v2799_v3  ;;  %v2805_v2 = vld [vmem:[#allocation70_spill] sm:$0xff] }
 0x10d   :  { %v1188_v25 = vpop.eup %1187  ;;  %v866_v39 = vmul.f32 %v1186_v21, %v2800_v30  ;;  %v635_v58 = vadd.f32 %v633_v1, %v631_v49  ;;  %v898_v17 = vmul.f32 %v1186_v21, %v2802_v26 }
 0x10e   :  { %v1190_v61 = vpop.eup %1189  ;;  %v868_v13 = vmul.f32 %v1188_v25, %v2801_v63  ;;  %v641_v57 = vadd.f32 %v639_v31, %v637_v46  ;;  %v900_v36 = vmul.f32 %v1188_v25, %v2803_v37 }
 0x10f   :  { %v1192_v48 = vpop.eup %1191  ;;  %v872_v8 = vmul.f32 %v1190_v61, %v2804_v22  ;;  %v643_v35 = vmul.f32 %v635_v58, %v1563_v6  ;;  %v653_v53 = vmul.f32 %v635_v58, %v1577_v10  ;;  %v663_v41 = vmul.f32 %v635_v58, %v1593_v15 }
 0x110   :  { %v1194_v4 = vpop.eup %1193  ;;  %v870_v62 = vadd.f32 %v868_v13, %v866_v39  ;;  %v876_v18 = vmul.f32 %v1192_v48, %v1895_v43  ;;  %v647_v55 = vmul.f32 %v641_v57, %v1565_v7  ;;  %v657_v54 = vmul.f32 %v641_v57, %v1579_v11 }
 0x111   :  { %v1196_v51 = vpop.eup %1195  ;;  %v880_v49 = vmul.f32 %v1194_v4, %v2786_v50  ;;  %v645_v56 = vadd.f32 %v643_v35, %v2805_v2  ;;  %v655_v46 = vadd.f32 %v653_v53, %v2806_v60  ;;  %v665_v1 = vadd.f32 %v663_v41, %v2807_v32  ;;  %v2808_v41 = vld [vmem:[#allocation73_spill] sm:$0xff] }
 0x112   :  { %v1198_v21 = vpop.eup %1197  ;;  %v874_v3 = vadd.f32 %v872_v8, %v870_v62  ;;  %v884_v31 = vmul.f32 %v1196_v51, %v2788_v38  ;;  %v667_v25 = vmul.f32 %v641_v57, %v1595_v16  ;;  %v673_v39 = vmul.f32 %v635_v58, %v1609_v19 }
 0x113   :  { %v1200_v13 = vpop.eup %1199  ;;  %v888_v15 = vmul.f32 %v1198_v21, %v1906_v44  ;;  %v649_v11 = vadd.f32 %v647_v55, %v645_v56  ;;  %v659_v10 = vadd.f32 %v657_v54, %v655_v46  ;;  %v677_v7 = vmul.f32 %v641_v57, %v1612_v20  ;;  %v2809_v54 = vld [vmem:[#allocation74_spill] sm:$0xff]  ;;  %v2810_v56 = vld [vmem:[#allocation75_spill] sm:$0xff] }
 0x114   :  { %v878_v35 = vadd.f32 %v876_v18, %v874_v3  ;;  %v892_v53 = vmul.f32 %v1200_v13, %v2760_v0  ;;  %v669_v60 = vadd.f32 %v667_v25, %v665_v1  ;;  %v675_v32 = vadd.f32 %v673_v39, %v2808_v41 }
 0x115   :  { %1201 = vtanh.f32 %v649_v11  ;;  %v683_v8 = vmul.f32 %v635_v58, %v1626_v23  ;;  %v687_v62 = vmul.f32 %v641_v57, %v1629_v24  ;;  %v693_v2 = vmul.f32 %v635_v58, %v1643_v27 }
 0x116   :  { %v882_v19 = vadd.f32 %v880_v49, %v878_v35  ;;  %1203 = vtanh.f32 %v659_v10  ;;  %v679_v16 = vadd.f32 %v677_v7, %v675_v32  ;;  %v697_v55 = vmul.f32 %v641_v57, %v1646_v28  ;;  %v2811_v49 = vld [vmem:[#allocation76_spill] sm:$0xff] }
 0x117   :  { %1205 = vtanh.f32 %v669_v60  ;;  %v685_v18 = vadd.f32 %v683_v8, %v2809_v54  ;;  %v695_v46 = vadd.f32 %v693_v2, %v2810_v56  ;;  %v703_v1 = vmul.f32 %v635_v58, %v1664_v33  ;;  %v2812_v60 = vld [vmem:[#allocation77_spill] sm:$0xff]  ;;  %v2813_v54 = vld [vmem:[#allocation66_spill] sm:$0xff] }
 0x118   :  { %v886_v3 = vadd.f32 %v884_v31, %v882_v19  ;;  %1207 = vtanh.f32 %v679_v16  ;;  %v707_v11 = vmul.f32 %v641_v57, %v2768_v12  ;;  %v713_v25 = vmul.f32 %v635_v58, %v2791_v40 }
 0x119   :  { %v689_v39 = vadd.f32 %v687_v62, %v685_v18  ;;  %v699_v27 = vadd.f32 %v697_v55, %v695_v46  ;;  %v705_v10 = vadd.f32 %v703_v1, %v2811_v49  ;;  %v717_v7 = vmul.f32 %v641_v57, %v2792_v59 }
 0x11a   :  { %v890_v32 = vadd.f32 %v888_v15, %v886_v3  ;;  %v715_v35 = vadd.f32 %v713_v25, %v2812_v60  ;;  %v902_v8 = vadd.f32 %v900_v36, %v898_v17  ;;  %v904_v2 = vmul.f32 %v1190_v61, %v2813_v54  ;;  %v2814_v36 = vld [vmem:[#allocation28_spill] sm:$0xff] }
 0x11b   :  { %1209 = vtanh.f32 %v689_v39  ;;  %v709_v56 = vadd.f32 %v707_v11, %v705_v10  ;;  %v908_v16 = vmul.f32 %v1192_v48, %v2785_v34  ;;  %v912_v19 = vmul.f32 %v1194_v4, %v2787_v42  ;;  %v2815_v48 = vld [vmem:[#allocation32_spill] sm:$0xff] }
 0x11c   :  { %v894_v31 = vadd.f32 %v892_v53, %v890_v32  ;;  %1211 = vtanh.f32 %v699_v27  ;;  %v719_v58 = vadd.f32 %v717_v7, %v715_v35  ;;  %v906_v62 = vadd.f32 %v904_v2, %v902_v8 }
 0x11d   :  { %1213 = vtanh.f32 %v709_v56  ;;  %v916_v57 = vmul.f32 %v1196_v51, %v2789_v14  ;;  %v920_v61 = vmul.f32 %v1198_v21, %v1961_v52  ;;  %v932_v18 = vadd.f32 1.0, %v2814_v36 }
 0x11e   :  { %v896_v55 = vadd.f32 %v894_v31, %v1912_v29  ;;  %1215 = vtanh.f32 %v719_v58  ;;  %v910_v15 = vadd.f32 %v908_v16, %v906_v62  ;;  %v924_v10 = vmul.f32 %v1200_v13, %v1964_v45 }
 0x11f   :  { %v1202_v17 = vpop.eup %1201  ;;  %v934_v16 = vmul.f32 %v932_v18, %v2300_v47  ;;  %v179_v36 = vlaneseq }
 0x120   :  { %v1204_v46 = vpop.eup %1203  ;;  %v930_v1 = vadd.f32 %v896_v55, %v2815_v48  ;;  %v723_v4 = vmul.f32 %v1202_v17, %v2800_v30  ;;  %v755_v27 = vmul.f32 %v1202_v17, %v2802_v26  ;;  %v914_v53 = vadd.f32 %v912_v19, %v910_v15  ;;  %v2816_v19 = vld [vmem:[#allocation30_spill] sm:$0xff] }
 0x121   :  { %v1206_v56 = vpop.eup %1205  ;;  %v725_v3 = vmul.f32 %v1204_v46, %v2801_v63  ;;  %v757_v11 = vmul.f32 %v1204_v46, %v2803_v37  ;;  %v946_v31 = vadd.f32 1.0, %v2816_v19 }
 0x122   :  { %v1208_v25 = vpop.eup %1207  ;;  %940 = vst [vmem:[#allocation17] sm:$0xff] %v930_v1  ;;  %v729_v51 = vmul.f32 %v1206_v56, %v2804_v22  ;;  %v761_v21 = vmul.f32 %v1206_v56, %v2813_v54  ;;  %v918_v39 = vadd.f32 %v916_v57, %v914_v53  ;;  %v936_v53 = vsub.f32 %v934_v16, %v930_v1 }
 0x123   :  { %v727_v7 = vadd.f32 %v725_v3, %v723_v4  ;;  %v733_v32 = vmul.f32 %v1208_v25, %v1895_v43  ;;  %v759_v35 = vadd.f32 %v757_v11, %v755_v27  ;;  %v765_v8 = vmul.f32 %v1208_v25, %v2785_v34 }
 0x124   :  { %v922_v2 = vadd.f32 %v920_v61, %v918_v39  ;;  %v948_v56 = vmul.f32 %v946_v31, %v2303_v5 }
 0x125   :  { %v1210_v58 = vpop.eup %1209  ;;  %v731_v62 = vadd.f32 %v729_v51, %v727_v7  ;;  %v763_v55 = vadd.f32 %v761_v21, %v759_v35  ;;  %v2817_v21 = vld [vmem:[#allocation57_spill] sm:$0xff] }
 0x126   :  { %v1212_v15 = vpop.eup %1211  ;;  %v737_v17 = vmul.f32 %v1210_v58, %v2786_v50  ;;  %v769_v57 = vmul.f32 %v1210_v58, %v2787_v42  ;;  %v926_v13 = vadd.f32 %v924_v10, %v922_v2  ;;  %v180_v10 = vshrl.u32 %v179_v36, 7 }
 0x127   :  { %v1214_v46 = vpop.eup %1213  ;;  %v735_v48 = vadd.f32 %v733_v32, %v731_v62  ;;  %v741_v4 = vmul.f32 %v1212_v15, %v2788_v38  ;;  %v767_v27 = vadd.f32 %v765_v8, %v763_v55  ;;  %v773_v61 = vmul.f32 %v1212_v15, %v2789_v14 }
 0x128   :  { %v1216_v47 = vpop.eup %1215  ;;  %v928_v18 = vadd.f32 %v926_v13, %v1971_v9  ;;  %v745_v11 = vmul.f32 %v1214_v46, %v1906_v44  ;;  %v777_v51 = vmul.f32 %v1214_v46, %v1961_v52  ;;  %v942_v2 = vmul.f32 %v936_v53, %v936_v53  ;;  %v2818_v13 = vld [vmem:[#allocation31_spill] sm:$0xff]  ;;  %v2819_v46 = vld [vmem:[#allocation33_spill] sm:$0xff] }
 0x129   :  { %v739_v3 = vadd.f32 %v737_v17, %v735_v48  ;;  %v771_v25 = vadd.f32 %v769_v57, %v767_v27  ;;  %v749_v32 = vmul.f32 %v1216_v47, %v2760_v0  ;;  %v781_v8 = vmul.f32 %v1216_v47, %v1964_v45 }
 0x12a   :  { %v944_v39 = vadd.f32 %v928_v18, %v2817_v21  ;;  %vm965_vm0 = vcmp.lt.s32.totalorder %v180_v10, 4  ;;  %v2822_v18 = vld [vmem:[#allocation36_spill] sm:$0xff] }
 0x12b   :  { %v743_v7 = vadd.f32 %v741_v4, %v739_v3  ;;  %v775_v35 = vadd.f32 %v773_v61, %v771_v25  ;;  %v2820_v4 = vld [vmem:[#allocation34_spill] sm:$0xff]  ;;  %v2821_v61 = vld [vmem:[#allocation35_spill] sm:$0xff] }
 0x12c   :  { %956 = vst [vmem:[#allocation17 + $0x10] sm:$0xff] %v944_v39  ;;  %v950_v1 = vsub.f32 %v948_v56, %v944_v39  ;;  %v2823_v56 = vld [vmem:[#allocation37_spill] sm:$0xff] }
 0x12d   :  { %v747_v16 = vadd.f32 %v745_v11, %v743_v7  ;;  %v779_v5 = vadd.f32 %v777_v51, %v775_v35 }
 0x12e   :  { %v958_v19 = vmul.f32 %v950_v1, %v950_v1 }
 0x12f   :  { %v751_v31 = vadd.f32 %v749_v32, %v747_v16  ;;  %v783_v58 = vadd.f32 %v781_v8, %v779_v5 }
 0x130   :  { %v960_v62 = vadd.f32 %v958_v19, %v942_v2 }
 0x131   :  { %v753_v55 = vadd.f32 %v751_v31, %v1912_v29  ;;  %v785_v15 = vadd.f32 %v783_v58, %v1971_v9 }
 0x132   :  { %v967_v17 = vsel %vm965_vm0, %v960_v62, 0.0 }
 0x133   :  { %v787_v57 = vmul.f32 %v753_v55, %v1563_v6  ;;  %v791_v36 = vmul.f32 %v785_v15, %v2818_v13  ;;  %v797_v48 = vmul.f32 %v753_v55, %v2819_v46  ;;  %v801_v27 = vmul.f32 %v785_v15, %v2820_v4  ;;  %939 = vst [vmem:[#allocation16 + $0x8] sm:$0xff] %v753_v55 }
 0x134   :  { %954 = vst [vmem:[#allocation16 + $0x18] sm:$0xff] %v785_v15  ;;  %978 = vst [vmem:[#allocation19] sm:$0xff] %v967_v17  ;;  %v807_v47 = vmul.f32 %v753_v55, %v2821_v61  ;;  %v811_v53 = vmul.f32 %v785_v15, %v2822_v18  ;;  %v817_v3 = vmul.f32 %v753_v55, %v2823_v56 }
 0x135   :  { %v821_v11 = vmul.f32 %v785_v15, %v1612_v20 }
 0x136   :  { %1348 = shalt.err (!%p1345_p3)
}
 0x137   :  { %s2824_s4 = sld [smem:[#allocation80_spill]] }
 0x13d   :  { %s1349_s6 = scalar_lea.hbm %s2824_s4, 512 }
 0x13e   :  { %p1350_p4 = scmp.ne.s32.totalorder %s2824_s4, %s1349_s6  ;;  %p1353_p5 = scmp.lt.u32.totalorder %s1349_s6, %s2824_s4 }
 0x140   :  { %p1355_p6 = pnand %p1353_p5, %p1350_p4 }
 0x142   :  { %1358 = shalt.err (!%p1355_p6)
}
 0x143   :  { %s2825_s3 = smov 8   ;;  %s2826_s22 = smov 128   ;;  %v2827_v6 = vld [vmem:[#allocation70_spill] sm:$0xff]  ;;  %v2828_v25 = vld [vmem:[#allocation71_spill] sm:$0xff]  ;;  %v827_v21 = vmul.f32 %v753_v55, %v1626_v23  ;;  %v831_v39 = vmul.f32 %v785_v15, %v1629_v24  ;;  %v2829_v10 = vld [vmem:[#allocation72_spill] sm:$0xff]  ;;  %v819_v32 = vadd.f32 %v817_v3, %v2808_v41  ;;  %v841_v2 = vmul.f32 %v785_v15, %v1646_v28 }
 0x144   :  { %990 = dma.vmem_to_hbm [thread:$0]  %s985_s18, 512, %s2824_s4, [#allocation5], %s2826_s22, %s2826_s22, %s2825_s3   ;;  %v789_v20 = vadd.f32 %v787_v57, %v2827_v6  ;;  %v799_v51 = vadd.f32 %v797_v48, %v2828_v25  ;;  %v809_v7 = vadd.f32 %v807_v47, %v2829_v10  ;;  %v2830_v35 = vld [vmem:[#allocation38_spill] sm:$0xff]  ;;  %v2831_v5 = vld [vmem:[#allocation74_spill] sm:$0xff]  ;;  %v847_v31 = vmul.f32 %v753_v55, %v1664_v33  ;;  %v2832_v17 = vld [vmem:[#allocation75_spill] sm:$0xff] }
 0x145   :  { %v837_v8 = vmul.f32 %v753_v55, %v2830_v35  ;;  %v829_v19 = vadd.f32 %v827_v21, %v2831_v5  ;;  %v823_v62 = vadd.f32 %v821_v11, %v819_v32  ;;  %v851_v24 = vmul.f32 %v785_v15, %v2768_v12  ;;  %s1427_s28 = smov [#allocation17]   ;;  %s1428_s30 = smov [#allocation19]  }
 0x146   :  { %v793_v1 = vadd.f32 %v791_v36, %v789_v20  ;;  %v803_v16 = vadd.f32 %v801_v27, %v799_v51  ;;  %v813_v58 = vadd.f32 %v811_v53, %v809_v7  ;;  %v849_v41 = vadd.f32 %v847_v31, %v2811_v49  ;;  %s996_s29 = sshll.u32 %s1427_s28, 4  ;;  %s1009_s2 = sshll.u32 %s1428_s30, 4  ;;  %s997_s29 = int_to_ptr.vmem [resolvable:$true] %s996_s29  ;;  %s1010_s2 = int_to_ptr.vmem [resolvable:$true] %s1009_s2 }
 0x147   :  { %v839_v23 = vadd.f32 %v837_v8, %v2832_v17  ;;  %v833_v57 = vadd.f32 %v831_v39, %v829_v19  ;;  %v857_v13 = vmul.f32 %v753_v55, %v2791_v40  ;;  %v861_v36 = vmul.f32 %v785_v15, %v2792_v59  ;;  %s1359_s13 = scalar_lea.vmem %s997_s29, 512  ;;  %p1364_p8 = scmp.lt.s32.totalorder %s997_s29, %s997_s29 }
 0x148   :  { %1217 = vtanh.f32 %v793_v1  ;;  %v853_v33 = vadd.f32 %v851_v24, %v849_v41  ;;  %v2834_v1 = vld [vmem:[#allocation63_spill] sm:$0xff]  ;;  %p1360_p7 = scmp.ne.s32.totalorder %s997_s29, %s1359_s13  ;;  %p1365_p9 = scmp.lt.s32.totalorder %s1359_s13, %s1359_s13 }
 0x149   :  { %1219 = vtanh.f32 %v803_v16  ;;  %v843_v28 = vadd.f32 %v841_v2, %v839_v23  ;;  %v859_v46 = vadd.f32 %v857_v13, %v2812_v60 }
 0x14a   :  { %1221 = vtanh.f32 %v813_v58  ;;  %p1366_p10 = por %p1365_p9, %p1364_p8 }
 0x14b   :  { %1223 = vtanh.f32 %v823_v62  ;;  %v863_v48 = vadd.f32 %v861_v36, %v859_v46 }
 0x14c   :  { %1225 = vtanh.f32 %v833_v57  ;;  %p1367_p11 = pnand %p1366_p10, %p1360_p7 }
 0x14d   :  { %1227 = vtanh.f32 %v843_v28 }
 0x14e   :  { %1229 = vtanh.f32 %v853_v33 }
 0x14f   :  { %1231 = vtanh.f32 %v863_v48 }
 0x152   :  { %v1218_v12 = vpop.eup %1217 }
 0x153   :  { %v1220_v4 = vpop.eup %1219  ;;  %v867_v49 = vmul.f32 %v1218_v12, %v2800_v30  ;;  %v899_v40 = vmul.f32 %v1218_v12, %v2802_v26 }
 0x154   :  { %v1222_v55 = vpop.eup %1221  ;;  %v869_v27 = vmul.f32 %v1220_v4, %v2801_v63  ;;  %v901_v59 = vmul.f32 %v1220_v4, %v2803_v37 }
 0x155   :  { %v1224_v15 = vpop.eup %1223  ;;  %v873_v60 = vmul.f32 %v1222_v55, %v2804_v22  ;;  %v905_v61 = vmul.f32 %v1222_v55, %v2813_v54 }
 0x156   :  { %v1226_v47 = vpop.eup %1225  ;;  %v871_v18 = vadd.f32 %v869_v27, %v867_v49  ;;  %v877_v53 = vmul.f32 %v1224_v15, %v1895_v43  ;;  %v903_v56 = vadd.f32 %v901_v59, %v899_v40  ;;  %v909_v3 = vmul.f32 %v1224_v15, %v2785_v34 }
 0x157   :  { %v1228_v30 = vpop.eup %1227  ;;  %v881_v26 = vmul.f32 %v1226_v47, %v2786_v50  ;;  %v913_v63 = vmul.f32 %v1226_v47, %v2787_v42 }
 0x158   :  { %v875_v11 = vadd.f32 %v873_v60, %v871_v18  ;;  %v907_v6 = vadd.f32 %v905_v61, %v903_v56  ;;  %v1230_v37 = vpop.eup %1229  ;;  %v885_v22 = vmul.f32 %v1228_v30, %v2788_v38  ;;  %v917_v54 = vmul.f32 %v1228_v30, %v2789_v14 }
 0x159   :  { %v1232_v51 = vpop.eup %1231  ;;  %v889_v43 = vmul.f32 %v1230_v37, %v1906_v44  ;;  %v921_v34 = vmul.f32 %v1230_v37, %v1961_v52  ;;  %v2833_v44 = vld [vmem:[#allocation29_spill] sm:$0xff] }
 0x15a   :  { %v879_v20 = vadd.f32 %v877_v53, %v875_v11  ;;  %v911_v25 = vadd.f32 %v909_v3, %v907_v6  ;;  %v893_v50 = vmul.f32 %v1232_v51, %v2760_v0  ;;  %v925_v42 = vmul.f32 %v1232_v51, %v1964_v45 }
 0x15c   :  { %v883_v21 = vadd.f32 %v881_v26, %v879_v20  ;;  %v915_v39 = vadd.f32 %v913_v63, %v911_v25 }
 0x15e   :  { %v887_v10 = vadd.f32 %v885_v22, %v883_v21  ;;  %v919_v7 = vadd.f32 %v917_v54, %v915_v39 }
 0x160   :  { %v891_v32 = vadd.f32 %v889_v43, %v887_v10  ;;  %v923_v35 = vadd.f32 %v921_v34, %v919_v7 }
 0x162   :  { %v895_v8 = vadd.f32 %v893_v50, %v891_v32  ;;  %v927_v38 = vadd.f32 %v925_v42, %v923_v35 }
 0x164   :  { %v897_v14 = vadd.f32 %v895_v8, %v1912_v29  ;;  %v929_v2 = vadd.f32 %v927_v38, %v1971_v9 }
 0x166   :  { %v931_v52 = vadd.f32 %v897_v14, %v2833_v44  ;;  %v945_v16 = vadd.f32 %v929_v2, %v2834_v1 }
 0x168   :  { %941 = vst [vmem:[#allocation17 + $0x8] sm:$0xff] %v931_v52  ;;  %957 = vst [vmem:[#allocation17 + $0x18] sm:$0xff] %v945_v16 }
 0x169   :  { %1370 = shalt.err (!%p1367_p11)
}
 0x16a   :  { %s2835_s10 = sld [smem:[#allocation81_spill]] }
 0x170   :  { %s1371_s11 = scalar_lea.hbm %s2835_s10, 512 }
 0x171   :  { %p1372_p12 = scmp.ne.s32.totalorder %s2835_s10, %s1371_s11  ;;  %p1375_p13 = scmp.lt.u32.totalorder %s1371_s11, %s2835_s10 }
 0x173   :  { %p1377_p0 = pnand %p1375_p13, %p1372_p12 }
 0x175   :  { %1380 = shalt.err (!%p1377_p0)
}
 0x176   :  { %1002 = dma.vmem_to_hbm [thread:$0]  %s997_s29, 512, %s2835_s10, [#allocation18], %s2826_s22, %s2826_s22, %s2825_s3  }
 0x177   :  { %s1381_s17 = scalar_lea.vmem %s1010_s2, 128  ;;  %p1386_p2 = scmp.lt.s32.totalorder %s1010_s2, %s1010_s2 }
 0x178   :  { %p1382_p1 = scmp.ne.s32.totalorder %s1010_s2, %s1381_s17  ;;  %p1387_p3 = scmp.lt.s32.totalorder %s1381_s17, %s1381_s17 }
 0x17a   :  { %p1388_p4 = por %p1387_p3, %p1386_p2 }
 0x17c   :  { %p1389_p5 = pnand %p1388_p4, %p1382_p1 }
 0x17e   :  { %1392 = shalt.err (!%p1389_p5)
}
 0x17f   :  { %s2836_s19 = sld [smem:[#allocation82_spill]] }
 0x185   :  { %s1393_s20 = scalar_lea.hbm %s2836_s19, 128 }
 0x186   :  { %p1394_p6 = scmp.ne.s32.totalorder %s2836_s19, %s1393_s20  ;;  %p1397_p7 = scmp.lt.u32.totalorder %s1393_s20, %s2836_s19 }
 0x188   :  { %p1399_p8 = pnand %p1397_p7, %p1394_p6 }
 0x18a   :  { %1402 = shalt.err (!%p1399_p8)
}
 0x18b   :  { %1012 = dma.vmem_to_hbm [thread:$0]  %s1010_s2, 128, %s2836_s19, [#allocation18]  }
 0x18c   :  { %1413 = dma.done.wait [#allocation5], 512  }
 0x18d   :  { %1414 = vsyncadd [#allocation5], 4294966784 }
 0x18e   :  { %1415 = dma.done.wait [#allocation18], 640  }
 0x18f   :  { %1416 = vsyncadd [#allocation18], 4294966656 }
 0x190   :  { %1022 = vsyncpa [#allocation4], 1 }
 0x191   :  { %1023 = vsyncpa [#allocation8], 1 }
 0x192   :  { %1024 = vsyncpa [#allocation5], 1 }
 0x193   :  { %1025 = vsyncpa [#allocation18], 1 }
 0x194   :  { %1026 = vsyncpa [#allocation6], 1 }
 0x195   :  { %1027 = vsyncpa [#allocation11], 1 }
 0x196   :  { %1028 = vsyncpa [#allocation14], 1 }

</bundles_post_ra>
